<compile_context>
chip_gen: v7x
topology: tpu7x:2x2x1
jax: 0.10.0
libtpu: 0.0.40
codegen_flags: <defaults>
</compile_context>

<pallas_src>
import jax
import jax.numpy as jnp
from jax.experimental import pallas as pl
from jax.experimental.pallas import tpu as pltpu

LANE = 128
_BN_EPS = 1e-5
_VMEM_LIMIT = 48 * 1024 * 1024  # < 64 MiB so the budget also holds on v7x


def _round_up(x, m):
    return (x + m - 1) // m * m


# ---------------------------------------------------------------------------
# Kernel 1: conv (stride-1 VALID on the pre-padded input) + per-batch-element
#           per-channel sum / sum-of-squares for training-mode BatchNorm.
# ---------------------------------------------------------------------------
def conv_stats_kernel(x_ref, w_ref, conv_ref, sum_ref, sqsum_ref):
    """x_ref:     (1, Hp, Wp, CIN_P)  padded NHWC input, one batch element
       w_ref:     (KH, KW, CIN_P, COUT_P)
       conv_ref:  (1, TH, W, COUT_P)  pre-BN conv output tile
       sum_ref:   (1, 1, COUT_P)      resident accumulators across H tiles
       sqsum_ref: (1, 1, COUT_P)
    """
    i = pl.program_id(1)  # H-tile index (the "arbitrary" accumulation axis)

    @pl.when(i == 0)
    def _init():
        sum_ref[...] = jnp.zeros_like(sum_ref)
        sqsum_ref[...] = jnp.zeros_like(sqsum_ref)

    KH, KW, CIN_P, COUT_P = w_ref.shape
    _, TH, W, _ = conv_ref.shape

    row0 = pl.multiple_of(i * TH, TH)
    acc = jnp.zeros((TH * W, COUT_P), jnp.float32)

    # kw is the sublane-shifted axis -> only KW relayout reads of the input
    # slab; the kh shift is a cheap leading-axis slice on the loaded value.
    for kw in range(KW):
        x_kw = x_ref[:, pl.ds(row0, TH + KH - 1), kw:kw + W, :]  # (1,TH+KH-1,W,CIN_P)
        for kh in range(KH):
            patch = x_kw[0, kh:kh + TH].reshape(TH * W, CIN_P)
            acc += jax.lax.dot_general(
                patch, w_ref[kh, kw],
                dimension_numbers=(((1,), (0,)), ((), ())),
                preferred_element_type=jnp.float32)

    # NOTE: conv bias intentionally omitted (exact no-op under train-mode BN).
    conv_ref[...] = acc.reshape(1, TH, W, COUT_P)

    # Per-channel partial batch statistics (channels on the lane axis).
    sum_ref[...] += jnp.sum(acc, axis=0, keepdims=True).reshape(1, 1, COUT_P)
    sqsum_ref[...] += jnp.sum(acc * acc, axis=0, keepdims=True).reshape(1, 1, COUT_P)


# ---------------------------------------------------------------------------
# Kernel 2: fused BatchNorm(scale, shift) + ReLU, one FMA per element.
# ---------------------------------------------------------------------------
def bn_relu_kernel(conv_ref, scale_ref, shift_ref, o_ref):
    c = o_ref.shape[-1]
    scale = scale_ref[...].reshape(1, 1, 1, c)
    shift = shift_ref[...].reshape(1, 1, 1, c)
    o_ref[...] = jnp.maximum(conv_ref[...] * scale + shift, 0.0)


# ---------------------------------------------------------------------------
# Wrapper: NCHW API, 'same' padding, channel padding, two pallas_calls.
# ---------------------------------------------------------------------------
def conv_block_forward(x_nchw, w_oihw, bias, gamma, beta, kernel_size=(3, 3)):
    del bias  # no-op under training-mode BatchNorm (removed by mean subtraction)
    kh, kw = kernel_size
    # nn.ZeroPad2d 'same' padding exactly as in the PyTorch module.
    pads = [(k // 2 + (k - 2 * (k // 2)) - 1, k // 2) for k in kernel_size[::-1]]
    (pad_left, pad_right), (pad_top, pad_bot) = pads[0], pads[1]

    N, Cin, H, W = x_nchw.shape
    Cout = w_oihw.shape[0]
    cin_p = _round_up(Cin, LANE)
    cout_p = _round_up(Cout, LANE)

    # NCHW -> NHWC, spatial zero-pad, lane-dense channel pad.
    x = jnp.transpose(x_nchw.astype(jnp.float32), (0, 2, 3, 1))
    x = jnp.pad(x, ((0, 0), (pad_top, pad_bot), (pad_left, pad_right),
                    (0, cin_p - Cin)))
    # OIHW -> (KH, KW, CIN_P, COUT_P); zero-padded channels contribute zero.
    w = jnp.transpose(w_oihw.astype(jnp.float32), (2, 3, 1, 0))
    w = jnp.pad(w, ((0, 0), (0, 0), (0, cin_p - Cin), (0, cout_p - Cout)))

    Hp = H + pad_top + pad_bot
    Wp = W + pad_left + pad_right
    assert Hp - kh + 1 == H and Wp - kw + 1 == W  # stride 1, 'same'

    # Output-row tile; TH*W is the matmul M dimension (128 at the test shape).
    TH = 8 if H % 8 == 0 else H
    n_h_tiles = H // TH

    conv_flops = 2 * N * H * W * kh * kw * cin_p * cout_p
    conv_bytes = 4 * (x.size + w.size + N * H * W * cout_p)

    conv_out, csum, csq = pl.pallas_call(
        conv_stats_kernel,
        grid=(N, n_h_tiles),
        in_specs=[
            # x block index is constant in i -> DMA'd once per batch element.
            pl.BlockSpec((1, Hp, Wp, cin_p), lambda n, i: (n, 0, 0, 0)),
            pl.BlockSpec((kh, kw, cin_p, cout_p), lambda n, i: (0, 0, 0, 0)),
        ],
        out_specs=[
            pl.BlockSpec((1, TH, W, cout_p), lambda n, i: (n, i, 0, 0)),
            pl.BlockSpec((1, 1, cout_p), lambda n, i: (n, 0, 0)),   # resident in i
            pl.BlockSpec((1, 1, cout_p), lambda n, i: (n, 0, 0)),   # resident in i
        ],
        out_shape=(
            jax.ShapeDtypeStruct((N, H, W, cout_p), jnp.float32),
            jax.ShapeDtypeStruct((N, 1, cout_p), jnp.float32),
            jax.ShapeDtypeStruct((N, 1, cout_p), jnp.float32),
        ),
        compiler_params=pltpu.CompilerParams(
            dimension_semantics=("parallel", "arbitrary"),
            vmem_limit_bytes=_VMEM_LIMIT),
        cost_estimate=pl.CostEstimate(
            flops=conv_flops, transcendentals=0, bytes_accessed=conv_bytes),
    )(x, w)

    # ---- tiny per-channel BN algebra (training-mode batch stats) in JAX ----
    cnt = float(N * H * W)
    mean = csum.sum(axis=(0, 1)) / cnt                               # (cout_p,)
    var = jnp.maximum(csq.sum(axis=(0, 1)) / cnt - mean * mean, 0.0)  # E[x^2]-m^2
    gamma_p = jnp.pad(gamma.astype(jnp.float32), (0, cout_p - Cout))
    beta_p = jnp.pad(beta.astype(jnp.float32), (0, cout_p - Cout))
    scale = (gamma_p * jax.lax.rsqrt(var + _BN_EPS)).reshape(1, cout_p)
    shift = (beta_p - mean * (scale[0])).reshape(1, cout_p)

    out_nhwc = pl.pallas_call(
        bn_relu_kernel,
        grid=(N, n_h_tiles),
        in_specs=[
            pl.BlockSpec((1, TH, W, cout_p), lambda n, i: (n, i, 0, 0)),
            pl.BlockSpec((1, cout_p), lambda n, i: (0, 0)),
            pl.BlockSpec((1, cout_p), lambda n, i: (0, 0)),
        ],
        out_specs=pl.BlockSpec((1, TH, W, cout_p), lambda n, i: (n, i, 0, 0)),
        out_shape=jax.ShapeDtypeStruct((N, H, W, cout_p), jnp.float32),
        compiler_params=pltpu.CompilerParams(
            dimension_semantics=("parallel", "parallel"),
            vmem_limit_bytes=_VMEM_LIMIT),
        cost_estimate=pl.CostEstimate(
            flops=3 * N * H * W * cout_p, transcendentals=0,
            bytes_accessed=8 * N * H * W * cout_p),
    )(conv_out, scale, shift)

    # TODO(synk): if the downstream consumer accepts NHWC, drop this transpose
    # (and the channel un-pad) to save one full HBM round trip.
    return jnp.transpose(out_nhwc[..., :Cout], (0, 3, 1, 2))  # back to NCHW


# ---------------------------------------------------------------------------
# Plain-JAX reference mirroring the PyTorch forward (training-mode BN).
# ---------------------------------------------------------------------------
def _reference_forward(x, w, b, gamma, beta):
    xp = jnp.pad(x, ((0, 0), (0, 0), (1, 1), (1, 1)))
    y = jax.lax.conv_general_dilated(
        xp, w, window_strides=(1, 1), padding='VALID',
        dimension_numbers=('NCHW', 'OIHW', 'NCHW')) + b.reshape(1, -1, 1, 1)
    mean = y.mean(axis=(0, 2, 3), keepdims=True)
    var = ((y - mean) ** 2).mean(axis=(0, 2, 3), keepdims=True)
    y = (y - mean) / jnp.sqrt(var + _BN_EPS)
    y = y * gamma.reshape(1, -1, 1, 1) + beta.reshape(1, -1, 1, 1)
    return jnp.maximum(y, 0.0)


if __name__ == "__main__":
    key = jax.random.PRNGKey(0)
    k_x, k_w, k_b = jax.random.split(key, 3)

    N, Cin, Hs, Ws = 2, 4, 16, 16
    Cout = 8
    KH, KW = 3, 3

    x = jax.random.normal(k_x, (N, Cin, Hs, Ws), dtype=jnp.float32)
    w = jax.random.normal(k_w, (Cout, Cin, KH, KW), dtype=jnp.float32) * 0.1
    b = jax.random.normal(k_b, (Cout,), dtype=jnp.float32) * 0.1
    gamma = jnp.ones((Cout,), dtype=jnp.float32)   # fresh nn.BatchNorm2d init
    beta = jnp.zeros((Cout,), dtype=jnp.float32)

    out = conv_block_forward(x, w, b, gamma, beta, kernel_size=(KH, KW))
    out = jax.block_until_ready(out)

    ref = _reference_forward(x, w, b, gamma, beta)
    assert out.shape == (N, Cout, Hs, Ws)
    assert jnp.allclose(out, ref, rtol=1e-4, atol=1e-4)

    print("KERNEL_OK")
</pallas_src>

<mosaic_0001>
module attributes {stable_mosaic.version = 11 : i64} {
  func.func @conv_stats_kernel(%arg0: i32, %arg1: i32, %arg2: memref<1x18x18x128xf32, #tpu.memory_space<vmem>>, %arg3: memref<3x3x128x128xf32, #tpu.memory_space<vmem>>, %arg4: memref<1x8x16x128xf32, #tpu.memory_space<vmem>>, %arg5: memref<1x1x128xf32, #tpu.memory_space<vmem>>, %arg6: memref<1x1x128xf32, #tpu.memory_space<vmem>>) attributes {dimension_semantics = [#tpu.dimension_semantics<parallel>, #tpu.dimension_semantics<arbitrary>], iteration_bounds = array<i64: 2, 2>, scalar_prefetch = 0 : i64, scratch_operands = 0 : i64, tpu.core_type = #tpu.core_type<tc>, window_params = [{transform_indices = @transform_0, window_bounds = array<i64: 1, 18, 18, 128>}, {pipeline_mode = #tpu.pipeline_mode<synchronous>, transform_indices = @transform_1, window_bounds = array<i64: 3, 3, 128, 128>}, {transform_indices = @transform_2, window_bounds = array<i64: 1, 8, 16, 128>}, {transform_indices = @transform_3, window_bounds = array<i64: 1, 1, 128>}, {transform_indices = @transform_4, window_bounds = array<i64: 1, 1, 128>}]} {
    %c0_i32 = arith.constant 0 : i32
    %0 = arith.cmpi eq, %arg1, %c0_i32 : i32
    %1 = arith.extui %0 : i1 to i32
    %c0_i32_0 = arith.constant 0 : i32
    %2 = arith.cmpi ne, %1, %c0_i32_0 : i32
    scf.if %2 {
      %cst_70 = arith.constant 0.000000e+00 : f32
      %90 = vector.broadcast %cst_70 : f32 to vector<1x1x128xf32>
      %c0_71 = arith.constant 0 : index
      %c0_72 = arith.constant 0 : index
      %c0_73 = arith.constant 0 : index
      %91 = vector.load %arg5[%c0_71, %c0_72, %c0_73] : memref<1x1x128xf32, #tpu.memory_space<vmem>>, vector<1x1x128xf32>
      tpu.vector_store %arg5[%c0_71, %c0_72, %c0_73], %90 {strides = array<i32>} : memref<1x1x128xf32, #tpu.memory_space<vmem>>, vector<1x1x128xf32>,
      %cst_74 = arith.constant 0.000000e+00 : f32
      %92 = vector.broadcast %cst_74 : f32 to vector<1x1x128xf32>
      %c0_75 = arith.constant 0 : index
      %c0_76 = arith.constant 0 : index
      %c0_77 = arith.constant 0 : index
      %93 = vector.load %arg6[%c0_75, %c0_76, %c0_77] : memref<1x1x128xf32, #tpu.memory_space<vmem>>, vector<1x1x128xf32>
      tpu.vector_store %arg6[%c0_75, %c0_76, %c0_77], %92 {strides = array<i32>} : memref<1x1x128xf32, #tpu.memory_space<vmem>>, vector<1x1x128xf32>,
    } else {
    }
    %c8_i32 = arith.constant 8 : i32
    %3 = arith.muli %arg1, %c8_i32 : i32
    %4 = tpu.assume_multiple %3, 8 : i32
    %cst = arith.constant 0.000000e+00 : f32
    %5 = vector.broadcast %cst : f32 to vector<128x128xf32>
    %c0 = arith.constant 0 : index
    %6 = arith.index_cast %4 : i32 to index
    %c0_1 = arith.constant 0 : index
    %c0_2 = arith.constant 0 : index
    %7 = vector.load %arg2[%c0, %6, %c0_1, %c0_2] : memref<1x18x18x128xf32, #tpu.memory_space<vmem>>, vector<1x10x16x128xf32>
    %8 = vector.extract_strided_slice %7 {offsets = [0, 0, 0, 0], sizes = [1, 8, 16, 128], strides = [1, 1, 1, 1]} : vector<1x10x16x128xf32> to vector<1x8x16x128xf32>
    %9 = vector.shape_cast %8 : vector<1x8x16x128xf32> to vector<8x16x128xf32>
    %10 = vector.shape_cast %9 : vector<8x16x128xf32> to vector<128x128xf32>
    %c0_3 = arith.constant 0 : index
    %c0_4 = arith.constant 0 : index
    %c0_5 = arith.constant 0 : index
    %c0_6 = arith.constant 0 : index
    %11 = vector.load %arg3[%c0_3, %c0_4, %c0_5, %c0_6] : memref<3x3x128x128xf32, #tpu.memory_space<vmem>>, vector<1x1x128x128xf32>
    %12 = vector.shape_cast %11 : vector<1x1x128x128xf32> to vector<128x128xf32>
    %cst_7 = arith.constant dense<0.000000e+00> : vector<128x128xf32>
    %13 = tpu.matmul %10, %12, %cst_7 {dimension_numbers = #tpu.dot_dimension_numbers<[1], [0], [0], [1], [0, 0, 1, 1], [], []>} : vector<128x128xf32>, vector<128x128xf32>, vector<128x128xf32> -> vector<128x128xf32>
    %14 = arith.addf %5, %13 : vector<128x128xf32>
    %15 = vector.extract_strided_slice %7 {offsets = [0, 1, 0, 0], sizes = [1, 8, 16, 128], strides = [1, 1, 1, 1]} : vector<1x10x16x128xf32> to vector<1x8x16x128xf32>
    %16 = vector.shape_cast %15 : vector<1x8x16x128xf32> to vector<8x16x128xf32>
    %17 = vector.shape_cast %16 : vector<8x16x128xf32> to vector<128x128xf32>
    %c1 = arith.constant 1 : index
    %c0_8 = arith.constant 0 : index
    %c0_9 = arith.constant 0 : index
    %c0_10 = arith.constant 0 : index
    %18 = vector.load %arg3[%c1, %c0_8, %c0_9, %c0_10] : memref<3x3x128x128xf32, #tpu.memory_space<vmem>>, vector<1x1x128x128xf32>
    %19 = vector.shape_cast %18 : vector<1x1x128x128xf32> to vector<128x128xf32>
    %cst_11 = arith.constant dense<0.000000e+00> : vector<128x128xf32>
    %20 = tpu.matmul %17, %19, %cst_11 {dimension_numbers = #tpu.dot_dimension_numbers<[1], [0], [0], [1], [0, 0, 1, 1], [], []>} : vector<128x128xf32>, vector<128x128xf32>, vector<128x128xf32> -> vector<128x128xf32>
    %21 = arith.addf %14, %20 : vector<128x128xf32>
    %22 = vector.extract_strided_slice %7 {offsets = [0, 2, 0, 0], sizes = [1, 8, 16, 128], strides = [1, 1, 1, 1]} : vector<1x10x16x128xf32> to vector<1x8x16x128xf32>
    %23 = vector.shape_cast %22 : vector<1x8x16x128xf32> to vector<8x16x128xf32>
    %24 = vector.shape_cast %23 : vector<8x16x128xf32> to vector<128x128xf32>
    %c2 = arith.constant 2 : index
    %c0_12 = arith.constant 0 : index
    %c0_13 = arith.constant 0 : index
    %c0_14 = arith.constant 0 : index
    %25 = vector.load %arg3[%c2, %c0_12, %c0_13, %c0_14] : memref<3x3x128x128xf32, #tpu.memory_space<vmem>>, vector<1x1x128x128xf32>
    %26 = vector.shape_cast %25 : vector<1x1x128x128xf32> to vector<128x128xf32>
    %cst_15 = arith.constant dense<0.000000e+00> : vector<128x128xf32>
    %27 = tpu.matmul %24, %26, %cst_15 {dimension_numbers = #tpu.dot_dimension_numbers<[1], [0], [0], [1], [0, 0, 1, 1], [], []>} : vector<128x128xf32>, vector<128x128xf32>, vector<128x128xf32> -> vector<128x128xf32>
    %28 = arith.addf %21, %27 : vector<128x128xf32>
    %c0_16 = arith.constant 0 : index
    %29 = arith.index_cast %4 : i32 to index
    %c1_17 = arith.constant 1 : index
    %c0_18 = arith.constant 0 : index
    %30 = vector.load %arg2[%c0_16, %29, %c1_17, %c0_18] : memref<1x18x18x128xf32, #tpu.memory_space<vmem>>, vector<1x10x16x128xf32>
    %31 = vector.extract_strided_slice %30 {offsets = [0, 0, 0, 0], sizes = [1, 8, 16, 128], strides = [1, 1, 1, 1]} : vector<1x10x16x128xf32> to vector<1x8x16x128xf32>
    %32 = vector.shape_cast %31 : vector<1x8x16x128xf32> to vector<8x16x128xf32>
    %33 = vector.shape_cast %32 : vector<8x16x128xf32> to vector<128x128xf32>
    %c0_19 = arith.constant 0 : index
    %c1_20 = arith.constant 1 : index
    %c0_21 = arith.constant 0 : index
    %c0_22 = arith.constant 0 : index
    %34 = vector.load %arg3[%c0_19, %c1_20, %c0_21, %c0_22] : memref<3x3x128x128xf32, #tpu.memory_space<vmem>>, vector<1x1x128x128xf32>
    %35 = vector.shape_cast %34 : vector<1x1x128x128xf32> to vector<128x128xf32>
    %cst_23 = arith.constant dense<0.000000e+00> : vector<128x128xf32>
    %36 = tpu.matmul %33, %35, %cst_23 {dimension_numbers = #tpu.dot_dimension_numbers<[1], [0], [0], [1], [0, 0, 1, 1], [], []>} : vector<128x128xf32>, vector<128x128xf32>, vector<128x128xf32> -> vector<128x128xf32>
    %37 = arith.addf %28, %36 : vector<128x128xf32>
    %38 = vector.extract_strided_slice %30 {offsets = [0, 1, 0, 0], sizes = [1, 8, 16, 128], strides = [1, 1, 1, 1]} : vector<1x10x16x128xf32> to vector<1x8x16x128xf32>
    %39 = vector.shape_cast %38 : vector<1x8x16x128xf32> to vector<8x16x128xf32>
    %40 = vector.shape_cast %39 : vector<8x16x128xf32> to vector<128x128xf32>
    %c1_24 = arith.constant 1 : index
    %c1_25 = arith.constant 1 : index
    %c0_26 = arith.constant 0 : index
    %c0_27 = arith.constant 0 : index
    %41 = vector.load %arg3[%c1_24, %c1_25, %c0_26, %c0_27] : memref<3x3x128x128xf32, #tpu.memory_space<vmem>>, vector<1x1x128x128xf32>
    %42 = vector.shape_cast %41 : vector<1x1x128x128xf32> to vector<128x128xf32>
    %cst_28 = arith.constant dense<0.000000e+00> : vector<128x128xf32>
    %43 = tpu.matmul %40, %42, %cst_28 {dimension_numbers = #tpu.dot_dimension_numbers<[1], [0], [0], [1], [0, 0, 1, 1], [], []>} : vector<128x128xf32>, vector<128x128xf32>, vector<128x128xf32> -> vector<128x128xf32>
    %44 = arith.addf %37, %43 : vector<128x128xf32>
    %45 = vector.extract_strided_slice %30 {offsets = [0, 2, 0, 0], sizes = [1, 8, 16, 128], strides = [1, 1, 1, 1]} : vector<1x10x16x128xf32> to vector<1x8x16x128xf32>
    %46 = vector.shape_cast %45 : vector<1x8x16x128xf32> to vector<8x16x128xf32>
    %47 = vector.shape_cast %46 : vector<8x16x128xf32> to vector<128x128xf32>
    %c2_29 = arith.constant 2 : index
    %c1_30 = arith.constant 1 : index
    %c0_31 = arith.constant 0 : index
    %c0_32 = arith.constant 0 : index
    %48 = vector.load %arg3[%c2_29, %c1_30, %c0_31, %c0_32] : memref<3x3x128x128xf32, #tpu.memory_space<vmem>>, vector<1x1x128x128xf32>
    %49 = vector.shape_cast %48 : vector<1x1x128x128xf32> to vector<128x128xf32>
    %cst_33 = arith.constant dense<0.000000e+00> : vector<128x128xf32>
    %50 = tpu.matmul %47, %49, %cst_33 {dimension_numbers = #tpu.dot_dimension_numbers<[1], [0], [0], [1], [0, 0, 1, 1], [], []>} : vector<128x128xf32>, vector<128x128xf32>, vector<128x128xf32> -> vector<128x128xf32>
    %51 = arith.addf %44, %50 : vector<128x128xf32>
    %c0_34 = arith.constant 0 : index
    %52 = arith.index_cast %4 : i32 to index
    %c2_35 = arith.constant 2 : index
    %c0_36 = arith.constant 0 : index
    %53 = vector.load %arg2[%c0_34, %52, %c2_35, %c0_36] : memref<1x18x18x128xf32, #tpu.memory_space<vmem>>, vector<1x10x16x128xf32>
    %54 = vector.extract_strided_slice %53 {offsets = [0, 0, 0, 0], sizes = [1, 8, 16, 128], strides = [1, 1, 1, 1]} : vector<1x10x16x128xf32> to vector<1x8x16x128xf32>
    %55 = vector.shape_cast %54 : vector<1x8x16x128xf32> to vector<8x16x128xf32>
    %56 = vector.shape_cast %55 : vector<8x16x128xf32> to vector<128x128xf32>
    %c0_37 = arith.constant 0 : index
    %c2_38 = arith.constant 2 : index
    %c0_39 = arith.constant 0 : index
    %c0_40 = arith.constant 0 : index
    %57 = vector.load %arg3[%c0_37, %c2_38, %c0_39, %c0_40] : memref<3x3x128x128xf32, #tpu.memory_space<vmem>>, vector<1x1x128x128xf32>
    %58 = vector.shape_cast %57 : vector<1x1x128x128xf32> to vector<128x128xf32>
    %cst_41 = arith.constant dense<0.000000e+00> : vector<128x128xf32>
    %59 = tpu.matmul %56, %58, %cst_41 {dimension_numbers = #tpu.dot_dimension_numbers<[1], [0], [0], [1], [0, 0, 1, 1], [], []>} : vector<128x128xf32>, vector<128x128xf32>, vector<128x128xf32> -> vector<128x128xf32>
    %60 = arith.addf %51, %59 : vector<128x128xf32>
    %61 = vector.extract_strided_slice %53 {offsets = [0, 1, 0, 0], sizes = [1, 8, 16, 128], strides = [1, 1, 1, 1]} : vector<1x10x16x128xf32> to vector<1x8x16x128xf32>
    %62 = vector.shape_cast %61 : vector<1x8x16x128xf32> to vector<8x16x128xf32>
    %63 = vector.shape_cast %62 : vector<8x16x128xf32> to vector<128x128xf32>
    %c1_42 = arith.constant 1 : index
    %c2_43 = arith.constant 2 : index
    %c0_44 = arith.constant 0 : index
    %c0_45 = arith.constant 0 : index
    %64 = vector.load %arg3[%c1_42, %c2_43, %c0_44, %c0_45] : memref<3x3x128x128xf32, #tpu.memory_space<vmem>>, vector<1x1x128x128xf32>
    %65 = vector.shape_cast %64 : vector<1x1x128x128xf32> to vector<128x128xf32>
    %cst_46 = arith.constant dense<0.000000e+00> : vector<128x128xf32>
    %66 = tpu.matmul %63, %65, %cst_46 {dimension_numbers = #tpu.dot_dimension_numbers<[1], [0], [0], [1], [0, 0, 1, 1], [], []>} : vector<128x128xf32>, vector<128x128xf32>, vector<128x128xf32> -> vector<128x128xf32>
    %67 = arith.addf %60, %66 : vector<128x128xf32>
    %68 = vector.extract_strided_slice %53 {offsets = [0, 2, 0, 0], sizes = [1, 8, 16, 128], strides = [1, 1, 1, 1]} : vector<1x10x16x128xf32> to vector<1x8x16x128xf32>
    %69 = vector.shape_cast %68 : vector<1x8x16x128xf32> to vector<8x16x128xf32>
    %70 = vector.shape_cast %69 : vector<8x16x128xf32> to vector<128x128xf32>
    %c2_47 = arith.constant 2 : index
    %c2_48 = arith.constant 2 : index
    %c0_49 = arith.constant 0 : index
    %c0_50 = arith.constant 0 : index
    %71 = vector.load %arg3[%c2_47, %c2_48, %c0_49, %c0_50] : memref<3x3x128x128xf32, #tpu.memory_space<vmem>>, vector<1x1x128x128xf32>
    %72 = vector.shape_cast %71 : vector<1x1x128x128xf32> to vector<128x128xf32>
    %cst_51 = arith.constant dense<0.000000e+00> : vector<128x128xf32>
    %73 = tpu.matmul %70, %72, %cst_51 {dimension_numbers = #tpu.dot_dimension_numbers<[1], [0], [0], [1], [0, 0, 1, 1], [], []>} : vector<128x128xf32>, vector<128x128xf32>, vector<128x128xf32> -> vector<128x128xf32>
    %74 = arith.addf %67, %73 : vector<128x128xf32>
    %75 = vector.shape_cast %74 : vector<128x128xf32> to vector<1x8x16x128xf32>
    %c0_52 = arith.constant 0 : index
    %c0_53 = arith.constant 0 : index
    %c0_54 = arith.constant 0 : index
    %c0_55 = arith.constant 0 : index
    %76 = vector.load %arg4[%c0_52, %c0_53, %c0_54, %c0_55] : memref<1x8x16x128xf32, #tpu.memory_space<vmem>>, vector<1x8x16x128xf32>
    tpu.vector_store %arg4[%c0_52, %c0_53, %c0_54, %c0_55], %75 {strides = array<i32>} : memref<1x8x16x128xf32, #tpu.memory_space<vmem>>, vector<1x8x16x128xf32>,
    %c0_56 = arith.constant 0 : index
    %c0_57 = arith.constant 0 : index
    %c0_58 = arith.constant 0 : index
    %77 = vector.load %arg5[%c0_56, %c0_57, %c0_58] : memref<1x1x128xf32, #tpu.memory_space<vmem>>, vector<1x1x128xf32>
    %cst_59 = arith.constant dense<0.000000e+00> : vector<128xf32>
    %78 = vector.multi_reduction <add>, %74, %cst_59 [0] : vector<128x128xf32> to vector<128xf32>
    %79 = vector.shape_cast %78 : vector<128xf32> to vector<1x128xf32>
    %80 = vector.shape_cast %79 : vector<1x128xf32> to vector<1x1x128xf32>
    %81 = arith.addf %77, %80 : vector<1x1x128xf32>
    %c0_60 = arith.constant 0 : index
    %c0_61 = arith.constant 0 : index
    %c0_62 = arith.constant 0 : index
    %82 = vector.load %arg5[%c0_60, %c0_61, %c0_62] : memref<1x1x128xf32, #tpu.memory_space<vmem>>, vector<1x1x128xf32>
    tpu.vector_store %arg5[%c0_60, %c0_61, %c0_62], %81 {strides = array<i32>} : memref<1x1x128xf32, #tpu.memory_space<vmem>>, vector<1x1x128xf32>,
    %c0_63 = arith.constant 0 : index
    %c0_64 = arith.constant 0 : index
    %c0_65 = arith.constant 0 : index
    %83 = vector.load %arg6[%c0_63, %c0_64, %c0_65] : memref<1x1x128xf32, #tpu.memory_space<vmem>>, vector<1x1x128xf32>
    %84 = arith.mulf %74, %74 : vector<128x128xf32>
    %cst_66 = arith.constant dense<0.000000e+00> : vector<128xf32>
    %85 = vector.multi_reduction <add>, %84, %cst_66 [0] : vector<128x128xf32> to vector<128xf32>
    %86 = vector.shape_cast %85 : vector<128xf32> to vector<1x128xf32>
    %87 = vector.shape_cast %86 : vector<1x128xf32> to vector<1x1x128xf32>
    %88 = arith.addf %83, %87 : vector<1x1x128xf32>
    %c0_67 = arith.constant 0 : index
    %c0_68 = arith.constant 0 : index
    %c0_69 = arith.constant 0 : index
    %89 = vector.load %arg6[%c0_67, %c0_68, %c0_69] : memref<1x1x128xf32, #tpu.memory_space<vmem>>, vector<1x1x128xf32>
    tpu.vector_store %arg6[%c0_67, %c0_68, %c0_69], %88 {strides = array<i32>} : memref<1x1x128xf32, #tpu.memory_space<vmem>>, vector<1x1x128xf32>,
    return
  }
  func.func @transform_0(%arg0: i32, %arg1: i32) -> (i32, i32, i32, i32) {
    %c0_i32 = arith.constant 0 : i32
    %c0_i32_0 = arith.constant 0 : i32
    %c0_i32_1 = arith.constant 0 : i32
    %c0_i32_2 = arith.constant 0 : i32
    return %arg0, %c0_i32, %c0_i32_0, %c0_i32_1 : i32, i32, i32, i32
  }
  func.func @transform_1(%arg0: i32, %arg1: i32) -> (i32, i32, i32, i32) {
    %c0_i32 = arith.constant 0 : i32
    %c0_i32_0 = arith.constant 0 : i32
    %c0_i32_1 = arith.constant 0 : i32
    %c0_i32_2 = arith.constant 0 : i32
    %c0_i32_3 = arith.constant 0 : i32
    return %c0_i32, %c0_i32_0, %c0_i32_1, %c0_i32_2 : i32, i32, i32, i32
  }
  func.func @transform_2(%arg0: i32, %arg1: i32) -> (i32, i32, i32, i32) {
    %c0_i32 = arith.constant 0 : i32
    %c0_i32_0 = arith.constant 0 : i32
    %c0_i32_1 = arith.constant 0 : i32
    return %arg0, %arg1, %c0_i32, %c0_i32_0 : i32, i32, i32, i32
  }
  func.func @transform_3(%arg0: i32, %arg1: i32) -> (i32, i32, i32) {
    %c0_i32 = arith.constant 0 : i32
    %c0_i32_0 = arith.constant 0 : i32
    %c0_i32_1 = arith.constant 0 : i32
    return %arg0, %c0_i32, %c0_i32_0 : i32, i32, i32
  }
  func.func @transform_4(%arg0: i32, %arg1: i32) -> (i32, i32, i32) {
    %c0_i32 = arith.constant 0 : i32
    %c0_i32_0 = arith.constant 0 : i32
    %c0_i32_1 = arith.constant 0 : i32
    return %arg0, %c0_i32, %c0_i32_0 : i32, i32, i32
  }
}

</mosaic_0001>

<bundles_post_ra>
// kernel: tpu_custom_call.1
= control target key start
LH: loop header
LB: loop body
LE: loop exit
PB: predicated region body
PF: predicated region fallthrough
CT: control target
= control target key end

     0   :  { %s4905_s0 = inlined_call_operand.vmem [shape: f32[2,18,18,128], index: 0, kind: input, shape index: {}]   ;;  %s4906_s1 = inlined_call_operand.vmem [shape: f32[3,3,128,128], index: 1, kind: input, shape index: {}]   ;;  %s4907_s2 = inlined_call_operand.hbm [shape: f32[2,16,16,128], index: 2, kind: output, shape index: {0}]   ;;  %s4908_s3 = inlined_call_operand.hbm [shape: f32[2,1,128], index: 3, kind: output, shape index: {1}]   ;;  %s4909_s4 = inlined_call_operand.hbm [shape: f32[2,1,128], index: 4, kind: output, shape index: {2}]  }
   0x1   :  { %4917 = sst [smem:[#allocation14_spill]] %s4905_s0 }
   0x2   :  { %10 = vsyncpa [#allocation3], 0 }
   0x3   :  { %12 = vsyncpa [#allocation3 + $0x1], 0 }
   0x4   :  { %13 = vsyncpa [#allocation5], 0 }
   0x5   :  { %15 = vsyncpa [#allocation5 + $0x1], 0  ;;  %s3819_s15 = smov 0   ;;  %s3821_s16 = smov 0  }
   0x6   :  { %s3823_s17 = smov 0   ;;  %s3825_s18 = smov 0  }
   0x7   :  { %s3827_s19 = smov 0   ;;  %s3829_s20 = smov 0  }
   0x8   :  { %s3831_s21 = smov 0   ;;  %s3833_s22 = smov 0  }
   0x9   :  { %s3835_s23 = smov 0   ;;  %s3837_s24 = smov 0  }
   0xa   :  { %s3839_s25 = smov 0  }
   0xb LB: > { %4918 = sst [smem:[#allocation9_spill]] %s3778_s23  ;;  %s4911_s26 = sadd.s32 4294967295, %s3786_s25   ;;  %s3786_s25 = sphi %s3839_s25, %s21_s25   ;;  %s3782_s24 = sphi %s3837_s24, %s4937_s24   ;;  %s3778_s23 = sphi %s3835_s23, %s4936_s23   ;;  %s3774_s22 = sphi %s3833_s22, %s4935_s22   ;;  %s3770_s21 = sphi %s3831_s21, %s4934_s21   ;;  %s3766_s20 = sphi %s3829_s20, %s4943_s20   ;;  %s3762_s19 = sphi %s3827_s19, %s4942_s19   ;;  %s3758_s18 = sphi %s3825_s18, %s4941_s18   ;;  %s3754_s17 = sphi %s3823_s17, %s4940_s17   ;;  %s3750_s16 = sphi %s3821_s16, %s4939_s16   ;;  %s3746_s15 = sphi %s3819_s15, %s4938_s15  }
   0xc   : > { %4919 = sst [smem:[#allocation10_spill]] %s3782_s24  ;;  %s4910_s27 = sadd.s32 4294967294, %s3786_s25  }
   0xd   : > { %s30_s28 = sadd.s32 1, %s3778_s23  ;;  %s33_s29 = sadd.s32 1, %s3782_s24 }
   0xe   : > { %p31_p0 = scmp.ge.s32.totalorder %s30_s28, 2  ;;  %s89_s30 = sadd.s32 1, %s3766_s20 }
   0xf   : > { %p99_p1 = scmp.ne.s32.totalorder %s3766_s20, %s3762_s19  ;;  %p3883_p2 = scmp.eq.s32.totalorder %s4911_s26, 3 }
  0x10   : > { %s4945_s28 = smov (%p31_p0, %s30_s28), 0  ;;  %s4947_s29 = smov (!%p31_p0, %s33_s29), %s3782_s24 }
  0x11   : > { %4921 = sst [smem:[#allocation11_spill]] %s4945_s28  ;;  %s85_s6 = ssub.s32 %s3778_s23, %s4945_s28 }
  0x12   : > { %p3894_p3 = por %p3883_p2, %p99_p1  ;;  %p35_p4 = scmp.ge.s32.totalorder %s4947_s29, 2 }
  0x13   : > { %p105_p5 = scmp.ne.s32.totalorder %s3762_s19, %s3758_s18  ;;  %p3902_p6 = scmp.eq.s32.totalorder %s4910_s27, 3 }
  0x14   : > { %s115_s9 = sadd.s32 1, %s3754_s17  ;;  %s4949_s29 = smov (%p35_p4, %s4947_s29), 0 }
  0x15   : > { %4924 = sst [smem:[#allocation12_spill]] %s4949_s29  ;;  %p3911_p7 = por %p3902_p6, %p105_p5 }
  0x16   : > { %p125_p8 = scmp.ne.s32.totalorder %s3754_s17, %s3750_s16  ;;  %s84_s11 = ssub.s32 %s3782_s24, %s4949_s29 }
  0x17   : > { %p131_p9 = scmp.ne.s32.totalorder %s3750_s16, %s3746_s15  ;;  %s86_s12 = sor.u32 %s85_s6, %s84_s11 }
  0x18   : > { %p113_p10 = scmp.eq.s32.totalorder %s84_s11, 0  ;;  %p87_p11 = scmp.eq.s32.totalorder %s86_s12, 0 }
  0x19   : > { %p3923_p12 = por %p125_p8, %p3883_p2  ;;  %p3935_p13 = por %p131_p9, %p3902_p6 }
  0x1a   : > { %s3928_s14 = scalar_select %p113_p10, %s3754_s17, %s115_s9  }
  0x1b   : > { %s3931_s27 = scalar_select %p87_p11, %s3766_s20, %s89_s30  }
  0x1c   : > { %p2131_p0 = scmp.ge.s32.totalorder %s3786_s25, 1  ;;  %p187_p1 = scmp.lt.s32.totalorder %s3786_s25, 5 }
  0x1d   : > { %4927 = sst [smem:[#allocation13_spill]] %s3931_s27 }
  0x1e   : > { %p188_p4 = pnand %p2131_p0, %p187_p1 }
  0x1f   : > { %s4915_s15 = sand.u32 (!%p188_p4), 1, %s3762_s19   ;;  %s213_s5 = sand.u32 (!%p188_p4), 1, %s3750_s16  }
  0x20   : > { %191 = sbr.rel (%p188_p4) target bundleno = 519 (0x207), region = 28  ;;  %s2132_s6 = sshll.u32 (!%p188_p4), %s4915_s15, 7 }
  0x21   : > { %p221_p2 = scmp.lt.s32.totalorder (!%p188_p4), %s3774_s22, 1  ;;  %s4929_s0 = sld [smem:[#allocation14_spill]] (!%p188_p4) }
  0x22   : > { %s3952_s29 = scalar_lea.vmem (!%p188_p4), [#allocation2], %s2132_s6  ;;  %s3954_s28 = scalar_lea.vmem (!%p188_p4), [#allocation4], %s213_s5 }
  0x23   : > { %s3956_s24 = scalar_lea.vmem (!%p188_p4), [#allocation6], %s213_s5  ;;  %p2134_p5 = scmp.ne.s32.totalorder (!%p188_p4), %s3770_s21, 0 }
  0x27   : > { %s222_s30 = scalar_select %p221_p2, %s3774_s22, 1 }
  0x28   : > { %230 = sbr.rel (%p2134_p5) target bundleno = 47 (0x2f), region = 32  ;;  %v3788_v0 = vmov (!%p2134_p5), 0.0  }
  0x29   : > { %s3499_s8 = smul.u32 432, %s222_s30  ;;  %231 = vst [vmem:[%s3954_s28] sm:$0x1] (!%p2134_p5), %v3788_v0  ;;  %232 = vst [vmem:[%s3956_s24] sm:$0x1] (!%p2134_p5), %v3788_v0 }
  0x2b   : > { %s3950_s12 = scalar_lea.vmem %s4929_s0, %s3499_s8 }
  0x2f PF: > { %v2137_v1 = vld [vmem:[%s4906_s1 + $0x180] sm:$0xff]  ;;  %v2138_v2 = vld [vmem:[%s4906_s1 + $0x188] sm:$0xff]  ;;  %v2139_v6 = vld [vmem:[%s4906_s1 + $0x190] sm:$0xff]  ;;  %s2136_s9 = smul.u32 192, %s3770_s21  ;;  %s2268_s27 = sshll.u32 %s3774_s22, 5 }
  0x30   : > { %v2185_v3 = vld [vmem:[%s4906_s1 + $0x200] sm:$0xff]  ;;  %v3067_v4 = vpack.c.bf16 %v2138_v2, %v2137_v1  ;;  %v2186_v5 = vld [vmem:[%s4906_s1 + $0x208] sm:$0xff]  ;;  %v2140_v7 = vld [vmem:[%s4906_s1 + $0x198] sm:$0xff]  ;;  %s1970_s30 = sshll.u32 %s3952_s29, 4  ;;  %s4930_s11 = sand.u32 1, %s3762_s19   ;;  %s4733_s30 = int_to_ptr.vmem [resolvable:$true] %s1970_s30 }
  0x31   : > { %v3195_v8 = vpack.c.bf16 %v2186_v5, %v2185_v3  ;;  %v3071_v9 = vpack.c.bf16 %v2140_v7, %v2139_v6  ;;  %v2187_v10 = vld [vmem:[%s4906_s1 + $0x210] sm:$0xff]  ;;  %v2188_v11 = vld [vmem:[%s4906_s1 + $0x218] sm:$0xff]  ;;  %v2141_v12 = vld [vmem:[%s4906_s1 + $0x1a0] sm:$0xff]  ;;  %s4011_s6 = scalar_lea.vmem %s3950_s12, %s2136_s9  ;;  %s4744_s23 = scalar_lea.sflag [#allocation3], %s4930_s11 }
  0x32   : > { %3068 = vmatprep.subr.bf16.mxu1 %v3067_v4  ;;  %v3199_v13 = vpack.c.bf16 %v2188_v11, %v2187_v10  ;;  %v2142_v14 = vld [vmem:[%s4906_s1 + $0x1a8] sm:$0xff]  ;;  %v2189_v15 = vld [vmem:[%s4906_s1 + $0x220] sm:$0xff]  ;;  %v2143_v19 = vld [vmem:[%s4906_s1 + $0x1b0] sm:$0xff]  ;;  %s3608_s12 = scalar_lea.vmem %s4733_s30, 2048  ;;  %s3789_s9 = smov [#allocation2]  }
  0x33   : > { %v2190_v16 = vld [vmem:[%s4906_s1 + $0x228] sm:$0xff]  ;;  %3196 = vmatprep.subr.bf16.mxu0 %v3195_v8  ;;  %3070 = vmatpush3.bf16.msra.mxu1 %v3067_v4  ;;  %v3075_v17 = vpack.c.bf16 %v2142_v14, %v2141_v12  ;;  %v2144_v20 = vld [vmem:[%s4906_s1 + $0x1b8] sm:$0xff]  ;;  %v2191_v21 = vld [vmem:[%s4906_s1 + $0x230] sm:$0xff]  ;;  %p3609_p6 = scmp.ne.s32.totalorder %s4733_s30, %s3608_s12 }
  0x34   : > { %3198 = vmatpush3.bf16.msra.mxu0 %v3195_v8  ;;  %3072 = vmatprep.subr.bf16.mxu1 %v3071_v9  ;;  %v3203_v18 = vpack.c.bf16 %v2190_v16, %v2189_v15  ;;  %v2192_v22 = vld [vmem:[%s4906_s1 + $0x238] sm:$0xff]  ;;  %v3079_v23 = vpack.c.bf16 %v2144_v20, %v2143_v19  ;;  %v2145_v25 = vld [vmem:[%s4906_s1 + $0x1c0] sm:$0xff]  ;;  %v2146_v26 = vld [vmem:[%s4906_s1 + $0x1c8] sm:$0xff] }
  0x35   : > { %3200 = vmatprep.subr.bf16.mxu0 %v3199_v13  ;;  %v3207_v24 = vpack.c.bf16 %v2192_v22, %v2191_v21  ;;  %v4020_v27 = vld [vmem:[%s4011_s6 + $0x18] sm:$0xff]  ;;  %v2193_v28 = vld [vmem:[%s4906_s1 + $0x240] sm:$0xff]  ;;  %v2194_v29 = vld [vmem:[%s4906_s1 + $0x248] sm:$0xff]  ;;  %v3083_v31 = vpack.c.bf16 %v2146_v26, %v2145_v25  ;;  %p3610_p8 = pnand %p3609_p6, %p3894_p3 }
  0x36   : > { %2595 = vmatprep.mubr.f32.mxu1 %v4020_v27  ;;  %v4030_v30 = vld [vmem:[%s4011_s6 + $0x19] sm:$0xff]  ;;  %v3211_v32 = vpack.c.bf16 %v2194_v29, %v2193_v28  ;;  %v2147_v33 = vld [vmem:[%s4906_s1 + $0x1d0] sm:$0xff]  ;;  %v2150_v40 = vld [vmem:[%s4906_s1 + $0x1e8] sm:$0xff] }
  0x37   : > { %3074 = vmatpush3.bf16.msra.mxu1 %v3071_v9  ;;  %2819 = vmatprep.mubr.f32.mxu0 %v4030_v30  ;;  %v2148_v34 = vld [vmem:[%s4906_s1 + $0x1d8] sm:$0xff]  ;;  %v2195_v35 = vld [vmem:[%s4906_s1 + $0x250] sm:$0xff]  ;;  %v2149_v39 = vld [vmem:[%s4906_s1 + $0x1e0] sm:$0xff]  ;;  %p3611_p9 = pneg %p3610_p8 }
  0x38   : > { %3202 = vmatpush3.bf16.msra.mxu0 %v3199_v13  ;;  %3076 = vmatprep.subr.bf16.mxu1 %v3075_v17  ;;  %v2196_v36 = vld [vmem:[%s4906_s1 + $0x258] sm:$0xff]  ;;  %v3087_v37 = vpack.c.bf16 %v2148_v34, %v2147_v33  ;;  %v2197_v41 = vld [vmem:[%s4906_s1 + $0x260] sm:$0xff]  ;;  %v2198_v42 = vld [vmem:[%s4906_s1 + $0x268] sm:$0xff]  ;;  %v3091_v43 = vpack.c.bf16 %v2150_v40, %v2149_v39 }
  0x39   : > { %3204 = vmatprep.subr.bf16.mxu0 %v3203_v18  ;;  %v3215_v38 = vpack.c.bf16 %v2196_v36, %v2195_v35  ;;  %v3219_v44 = vpack.c.bf16 %v2198_v42, %v2197_v41  ;;  %v2151_v45 = vld [vmem:[%s4906_s1 + $0x1f0] sm:$0xff]  ;;  %v2152_v46 = vld [vmem:[%s4906_s1 + $0x1f8] sm:$0xff]  ;;  %v256_v51 = vld [vmem:[%s4906_s1] sm:$0xff] }
  0x3a   : > { %v2199_v47 = vld [vmem:[%s4906_s1 + $0x270] sm:$0xff]  ;;  %v2200_v48 = vld [vmem:[%s4906_s1 + $0x278] sm:$0xff]  ;;  %v3095_v49 = vpack.c.bf16 %v2152_v46, %v2151_v45  ;;  %v257_v52 = vld [vmem:[%s4906_s1 + $0x8] sm:$0xff] }
  0x3b   : > { %3078 = vmatpush3.bf16.msra.mxu1 %v3075_v17  ;;  %v3223_v50 = vpack.c.bf16 %v2200_v48, %v2199_v47  ;;  %v2201_v53 = vld [vmem:[%s4906_s1 + $0x380] sm:$0xff]  ;;  %v2202_v54 = vld [vmem:[%s4906_s1 + $0x388] sm:$0xff]  ;;  %v3099_v55 = vpack.c.bf16 %v257_v52, %v256_v51  ;;  %v258_v57 = vld [vmem:[%s4906_s1 + $0x10] sm:$0xff] }
  0x3c   : > { %3206 = vmatpush3.bf16.msra.mxu0 %v3203_v18  ;;  %3080 = vmatprep.subr.bf16.mxu1 %v3079_v23  ;;  %v3227_v56 = vpack.c.bf16 %v2202_v54, %v2201_v53  ;;  %v259_v58 = vld [vmem:[%s4906_s1 + $0x18] sm:$0xff]  ;;  %v4088_v59 = vld [vmem:[%s4011_s6 + $0x20] sm:$0xff]  ;;  %v2203_v60 = vld [vmem:[%s4906_s1 + $0x390] sm:$0xff] }
  0x3d   : > { %3208 = vmatprep.subr.bf16.mxu0 %v3207_v24  ;;  %v2204_v61 = vld [vmem:[%s4906_s1 + $0x398] sm:$0xff]  ;;  %v4097_v62 = vld [vmem:[%s4011_s6 + $0x21] sm:$0xff]  ;;  %v4100_v63 = vld [vmem:[%s4011_s6 + $0x30] sm:$0xff]  ;;  %v3103_v0 = vpack.c.bf16 %v259_v58, %v258_v57 }
  0x3e   : > { %v4104_v1 = vld [vmem:[%s4011_s6 + $0x31] sm:$0xff]  ;;  %v3231_v2 = vpack.c.bf16 %v2204_v61, %v2203_v60  ;;  %v260_v3 = vld [vmem:[%s4906_s1 + $0x20] sm:$0xff]  ;;  %v261_v4 = vld [vmem:[%s4906_s1 + $0x28] sm:$0xff] }
  0x3f   : > { %3082 = vmatpush3.bf16.msra.mxu1 %v3079_v23  ;;  %v4114_v5 = vld [vmem:[%s4011_s6 + $0x38] sm:$0xff]  ;;  %v2205_v6 = vld [vmem:[%s4906_s1 + $0x3a0] sm:$0xff]  ;;  %v2206_v7 = vld [vmem:[%s4906_s1 + $0x3a8] sm:$0xff]  ;;  %v3107_v10 = vpack.c.bf16 %v261_v4, %v260_v3 }
  0x40   : > { %3210 = vmatpush3.bf16.msra.mxu0 %v3207_v24  ;;  %3084 = vmatprep.subr.bf16.mxu1 %v3083_v31  ;;  %v4124_v8 = vld [vmem:[%s4011_s6 + $0x39] sm:$0xff]  ;;  %v4128_v9 = vld [vmem:[%s4011_s6 + $0x48] sm:$0xff]  ;;  %v3235_v12 = vpack.c.bf16 %v2206_v7, %v2205_v6  ;;  %v262_v13 = vld [vmem:[%s4906_s1 + $0x30] sm:$0xff] }
  0x41   : > { %3212 = vmatprep.subr.bf16.mxu0 %v3211_v32  ;;  %v4132_v11 = vld [vmem:[%s4011_s6 + $0x49] sm:$0xff]  ;;  %v263_v14 = vld [vmem:[%s4906_s1 + $0x38] sm:$0xff]  ;;  %v4156_v19 = vld [vmem:[%s4011_s6 + $0x60] sm:$0xff] }
  0x42   : > { %v4142_v15 = vld [vmem:[%s4011_s6 + $0x50] sm:$0xff]  ;;  %v2208_v17 = vld [vmem:[%s4906_s1 + $0x3b8] sm:$0xff]  ;;  %v3111_v20 = vpack.c.bf16 %v263_v14, %v262_v13  ;;  %v4160_v21 = vld [vmem:[%s4011_s6 + $0x61] sm:$0xff] }
  0x43   : > { %3086 = vmatpush3.bf16.msra.mxu1 %v3083_v31  ;;  %v2207_v16 = vld [vmem:[%s4906_s1 + $0x3b0] sm:$0xff]  ;;  %v264_v23 = vld [vmem:[%s4906_s1 + $0x40] sm:$0xff]  ;;  %v265_v24 = vld [vmem:[%s4906_s1 + $0x48] sm:$0xff] }
  0x44   : > { %3214 = vmatpush3.bf16.msra.mxu0 %v3211_v32  ;;  %3088 = vmatprep.subr.bf16.mxu1 %v3087_v37  ;;  %v4152_v18 = vld [vmem:[%s4011_s6 + $0x51] sm:$0xff]  ;;  %v3239_v22 = vpack.c.bf16 %v2208_v17, %v2207_v16  ;;  %v4170_v25 = vld [vmem:[%s4011_s6 + $0x68] sm:$0xff]  ;;  %v2209_v26 = vld [vmem:[%s4906_s1 + $0x3c0] sm:$0xff]  ;;  %v3115_v32 = vpack.c.bf16 %v265_v24, %v264_v23 }
  0x45   : > { %3216 = vmatprep.subr.bf16.mxu0 %v3215_v38  ;;  %v2210_v28 = vld [vmem:[%s4906_s1 + $0x3c8] sm:$0xff]  ;;  %v4184_v31 = vld [vmem:[%s4011_s6 + $0x78] sm:$0xff]  ;;  %v266_v35 = vld [vmem:[%s4906_s1 + $0x50] sm:$0xff] }
  0x46   : > { %v4180_v29 = vld [vmem:[%s4011_s6 + $0x69] sm:$0xff]  ;;  %v4188_v33 = vld [vmem:[%s4011_s6 + $0x79] sm:$0xff]  ;;  %v3243_v34 = vpack.c.bf16 %v2210_v28, %v2209_v26  ;;  %v4208_v40 = vld [vmem:[%s4011_s6 + $0x81] sm:$0xff] }
  0x47   : > { %3090 = vmatpush3.bf16.msra.mxu1 %v3087_v37  ;;  %v267_v36 = vld [vmem:[%s4906_s1 + $0x58] sm:$0xff]  ;;  %v4198_v37 = vld [vmem:[%s4011_s6 + $0x80] sm:$0xff]  ;;  %v4212_v41 = vld [vmem:[%s4011_s6 + $0x90] sm:$0xff] }
  0x48   : > { %3218 = vmatpush3.bf16.msra.mxu0 %v3215_v38  ;;  %3092 = vmatprep.subr.bf16.mxu1 %v3091_v43  ;;  %v2211_v38 = vld [vmem:[%s4906_s1 + $0x3d0] sm:$0xff]  ;;  %v2212_v39 = vld [vmem:[%s4906_s1 + $0x3d8] sm:$0xff]  ;;  %v3119_v42 = vpack.c.bf16 %v267_v36, %v266_v35  ;;  %v268_v45 = vld [vmem:[%s4906_s1 + $0x60] sm:$0xff] }
  0x49   : > { %3220 = vmatprep.subr.bf16.mxu0 %v3219_v44  ;;  %v269_v46 = vld [vmem:[%s4906_s1 + $0x68] sm:$0xff]  ;;  %v4226_v47 = vld [vmem:[%s4011_s6 + $0x98] sm:$0xff]  ;;  %v2213_v48 = vld [vmem:[%s4906_s1 + $0x3e0] sm:$0xff] }
  0x4a   : > { %v4240_v51 = vld [vmem:[%s4011_s6 + $0xa8] sm:$0xff]  ;;  %v3123_v52 = vpack.c.bf16 %v269_v46, %v268_v45  ;;  %v4254_v57 = vld [vmem:[%s4011_s6 + $0xb0] sm:$0xff]  ;;  %v2216_v60 = vld [vmem:[%s4906_s1 + $0x3f8] sm:$0xff] }
  0x4b   : > { %3094 = vmatpush3.bf16.msra.mxu1 %v3091_v43  ;;  %v4216_v43 = vld [vmem:[%s4011_s6 + $0x91] sm:$0xff]  ;;  %v4244_v53 = vld [vmem:[%s4011_s6 + $0xa9] sm:$0xff]  ;;  %v4272_v3 = vld [vmem:[%s4011_s6 + $0xc1] sm:$0xff] }
  0x4c   : > { %3222 = vmatpush3.bf16.msra.mxu0 %v3219_v44  ;;  %3096 = vmatprep.subr.bf16.mxu1 %v3095_v49  ;;  %v3247_v44 = vpack.c.bf16 %v2212_v39, %v2211_v38  ;;  %v2215_v58 = vld [vmem:[%s4906_s1 + $0x3f0] sm:$0xff]  ;;  %v2153_v6 = vld [vmem:[%s4906_s1 + $0x300] sm:$0xff]  ;;  %v2154_v7 = vld [vmem:[%s4906_s1 + $0x308] sm:$0xff] }
  0x4d   : > { %3224 = vmatprep.subr.bf16.mxu0 %v3223_v50  ;;  %v4264_v61 = vld [vmem:[%s4011_s6 + $0xb1] sm:$0xff]  ;;  %v3255_v4 = vpack.c.bf16 %v2216_v60, %v2215_v58  ;;  %v2218_v13 = vld [vmem:[%s4906_s1 + $0x108] sm:$0xff]  ;;  %v236_v16 = vld [vmem:[%s4011_s6] sm:$0xff]  ;;  %v3131_v17 = vpack.c.bf16 %v2154_v7, %v2153_v6 }
  0x4e   : > { %v4292_v14 = vld [vmem:[%s4011_s6 + $0xc9] sm:$0xff]  ;;  %v2156_v23 = vld [vmem:[%s4906_s1 + $0x318] sm:$0xff]  ;;  %v2157_v35 = vld [vmem:[%s4906_s1 + $0x320] sm:$0xff] }
  0x4f   : > { %3098 = vmatpush3.bf16.msra.mxu1 %v3095_v49  ;;  %v2214_v49 = vld [vmem:[%s4906_s1 + $0x3e8] sm:$0xff]  ;;  %v2219_v26 = vld [vmem:[%s4906_s1 + $0x110] sm:$0xff]  ;;  %v2220_v28 = vld [vmem:[%s4906_s1 + $0x118] sm:$0xff] }
  0x50   : > { %3226 = vmatpush3.bf16.msra.mxu0 %v3223_v50  ;;  %3100 = vmatprep.subr.bf16.mxu1 %v3099_v55  ;;  %v4236_v50 = vld [vmem:[%s4011_s6 + $0x99] sm:$0xff]  ;;  %v3251_v54 = vpack.c.bf16 %v2214_v49, %v2213_v48  ;;  %v237_v24 = vld [vmem:[%s4011_s6 + $0x8] sm:$0xff]  ;;  %v2159_v45 = vld [vmem:[%s4906_s1 + $0x330] sm:$0xff] }
  0x51   : > { %3228 = vmatprep.subr.bf16.mxu0 %v3227_v56  ;;  %v2158_v36 = vld [vmem:[%s4906_s1 + $0x328] sm:$0xff]  ;;  %v2221_v38 = vld [vmem:[%s4906_s1 + $0x120] sm:$0xff]  ;;  %v2160_v46 = vld [vmem:[%s4906_s1 + $0x338] sm:$0xff] }
  0x52   : > { %2596 = vmatmul.mubr.f32.vlgmr.msra.gmra.mrb[0].mxu1 %v4088_v59  ;;  %v2222_v39 = vld [vmem:[%s4906_s1 + $0x128] sm:$0xff]  ;;  %v3143_v48 = vpack.c.bf16 %v2160_v46, %v2159_v45  ;;  %v2227_v6 = vld [vmem:[%s4906_s1 + $0x150] sm:$0xff]  ;;  %v2228_v7 = vld [vmem:[%s4906_s1 + $0x158] sm:$0xff] }
  0x53   : > { %2820 = vmatmul.mubr.f32.vlgmr.msra.gmra.mrb[0].mxu0 %v4097_v62  ;;  %3102 = vmatpush3.bf16.msra.mxu1 %v3099_v55  ;;  %v270_v55 = vld [vmem:[%s4906_s1 + $0x70] sm:$0xff]  ;;  %v776_v45 = vld [vmem:[%s4011_s6 + $0xe1] sm:$0xff] }
  0x54   : > { %3230 = vmatpush3.bf16.msra.mxu0 %v3227_v56  ;;  %2598 = vmatprep.mubr.f32.mxu1 %v4100_v63  ;;  %v271_v56 = vld [vmem:[%s4906_s1 + $0x78] sm:$0xff] }
  0x55   : > { %2822 = vmatprep.mubr.f32.mxu0 %v4104_v1  ;;  %3104 = vmatprep.subr.bf16.mxu1 %v3103_v0 }
  0x56   : > { %2599 = vmatmul.mubr.f32.gmra.mrb[2].mxu1 %v4114_v5  ;;  %3232 = vmatprep.subr.bf16.mxu0 %v3231_v2 }
  0x57   : > { %2823 = vmatmul.mubr.f32.gmra.mrb[2].mxu0 %v4124_v8  ;;  %3106 = vmatpush3.bf16.msra.mxu1 %v3103_v0  ;;  %v4268_v0 = vld [vmem:[%s4011_s6 + $0xc0] sm:$0xff] }
  0x58   : > { %3234 = vmatpush3.bf16.msra.mxu0 %v3231_v2  ;;  %2601 = vmatprep.mubr.f32.mxu1 %v4128_v9  ;;  %v3127_v2 = vpack.c.bf16 %v271_v56, %v270_v55  ;;  %v2225_v55 = vld [vmem:[%s4906_s1 + $0x140] sm:$0xff]  ;;  %v2226_v56 = vld [vmem:[%s4906_s1 + $0x148] sm:$0xff] }
  0x59   : > { %2825 = vmatprep.mubr.f32.mxu0 %v4132_v11  ;;  %3108 = vmatprep.subr.bf16.mxu1 %v3107_v10  ;;  %v3275_v60 = vpack.c.bf16 %v2226_v56, %v2225_v55  ;;  %v4442_v56 = vld [vmem:[%s4011_s6 + $0x1a] sm:$0xff] }
  0x5a   : > { %2602 = vmatmul.mubr.f32.gmra.mrb[4].mxu1 %v4142_v15  ;;  %3236 = vmatprep.subr.bf16.mxu0 %v3235_v12 }
  0x5b   : > { %2826 = vmatmul.mubr.f32.gmra.mrb[4].mxu0 %v4152_v18  ;;  %3110 = vmatpush3.bf16.msra.mxu1 %v3107_v10  ;;  %v4282_v10 = vld [vmem:[%s4011_s6 + $0xc8] sm:$0xff] }
  0x5c   : > { %3238 = vmatpush3.bf16.msra.mxu0 %v3235_v12  ;;  %2604 = vmatprep.mubr.f32.mxu1 %v4156_v19  ;;  %v2217_v12 = vld [vmem:[%s4906_s1 + $0x100] sm:$0xff] }
  0x5d   : > { %2828 = vmatprep.mubr.f32.mxu0 %v4160_v21  ;;  %3112 = vmatprep.subr.bf16.mxu1 %v3111_v20 }
  0x5e   : > { %2605 = vmatmul.mubr.f32.gmra.mrb[6].mxu1 %v4170_v25  ;;  %3240 = vmatprep.subr.bf16.mxu0 %v3239_v22 }
  0x5f   : > { %2829 = vmatmul.mubr.f32.gmra.mrb[6].mxu0 %v4180_v29  ;;  %3114 = vmatpush3.bf16.msra.mxu1 %v3111_v20  ;;  %v3259_v20 = vpack.c.bf16 %v2218_v13, %v2217_v12  ;;  %v3279_v13 = vpack.c.bf16 %v2228_v7, %v2227_v6  ;;  %v4463_v7 = vld [vmem:[%s4011_s6 + $0x32] sm:$0xff] }
  0x60   : > { %3242 = vmatpush3.bf16.msra.mxu0 %v3239_v22  ;;  %2607 = vmatprep.mubr.f32.mxu1 %v4184_v31  ;;  %v2155_v22 = vld [vmem:[%s4906_s1 + $0x310] sm:$0xff] }
  0x61   : > { %2831 = vmatprep.mubr.f32.mxu0 %v4188_v33  ;;  %3116 = vmatprep.subr.bf16.mxu1 %v3115_v32 }
  0x62   : > { %2608 = vmatmul.mubr.f32.gmra.mrb[8].mxu1 %v4198_v37  ;;  %3244 = vmatprep.subr.bf16.mxu0 %v3243_v34 }
  0x63   : > { %2832 = vmatmul.mubr.f32.gmra.mrb[8].mxu0 %v4208_v40  ;;  %3118 = vmatpush3.bf16.msra.mxu1 %v3115_v32  ;;  %v3135_v32 = vpack.c.bf16 %v2156_v23, %v2155_v22  ;;  %v2230_v22 = vld [vmem:[%s4906_s1 + $0x168] sm:$0xff] }
  0x64   : > { %3246 = vmatpush3.bf16.msra.mxu0 %v3243_v34  ;;  %2610 = vmatprep.mubr.f32.mxu1 %v4212_v41  ;;  %v3263_v34 = vpack.c.bf16 %v2220_v28, %v2219_v26  ;;  %v2167_v26 = vld [vmem:[%s4906_s1 + $0x370] sm:$0xff]  ;;  %v2168_v28 = vld [vmem:[%s4906_s1 + $0x378] sm:$0xff] }
  0x65   : > { %2834 = vmatprep.mubr.f32.mxu0 %v4216_v43  ;;  %3120 = vmatprep.subr.bf16.mxu1 %v3119_v42 }
  0x66   : > { %2611 = vmatmul.mubr.f32.gmra.mrb[10].mxu1 %v4226_v47  ;;  %3248 = vmatprep.subr.bf16.mxu0 %v3247_v44 }
  0x67   : > { %2835 = vmatmul.mubr.f32.gmra.mrb[10].mxu0 %v4236_v50  ;;  %3122 = vmatpush3.bf16.msra.mxu1 %v3119_v42  ;;  %v3139_v42 = vpack.c.bf16 %v2158_v36, %v2157_v35  ;;  %v3159_v35 = vpack.c.bf16 %v2168_v28, %v2167_v26  ;;  %v775_v36 = vld [vmem:[%s4011_s6 + $0xd9] sm:$0xff]  ;;  %v2242_v26 = vld [vmem:[%s4906_s1 + $0x2c8] sm:$0xff] }
  0x68   : > { %3250 = vmatpush3.bf16.msra.mxu0 %v3247_v44  ;;  %2613 = vmatprep.mubr.f32.mxu1 %v4240_v51  ;;  %v3267_v44 = vpack.c.bf16 %v2222_v39, %v2221_v38  ;;  %v2169_v39 = vld [vmem:[%s4906_s1 + $0x80] sm:$0xff]  ;;  %v4502_v28 = vld [vmem:[%s4011_s6 + $0x52] sm:$0xff] }
  0x69   : > { %2837 = vmatprep.mubr.f32.mxu0 %v4244_v53  ;;  %3124 = vmatprep.subr.bf16.mxu1 %v3123_v52 }
  0x6a   : > { %2614 = vmatmul.mubr.f32.gmra.mrb[12].mxu1 %v4254_v57  ;;  %3252 = vmatprep.subr.bf16.mxu0 %v3251_v54 }
  0x6b   : > { %2838 = vmatmul.mubr.f32.gmra.mrb[12].mxu0 %v4264_v61  ;;  %3126 = vmatpush3.bf16.msra.mxu1 %v3123_v52  ;;  %v2161_v52 = vld [vmem:[%s4906_s1 + $0x340] sm:$0xff] }
  0x6c   : > { %3254 = vmatpush3.bf16.msra.mxu0 %v3251_v54  ;;  %2616 = vmatprep.mubr.f32.mxu1 %v4268_v0  ;;  %v2162_v54 = vld [vmem:[%s4906_s1 + $0x348] sm:$0xff] }
  0x6d   : > { %2840 = vmatprep.mubr.f32.mxu0 %v4272_v3  ;;  %3128 = vmatprep.subr.bf16.mxu1 %v3127_v2  ;;  %v3147_v58 = vpack.c.bf16 %v2162_v54, %v2161_v52  ;;  %v2236_v52 = vld [vmem:[%s4906_s1 + $0x298] sm:$0xff]  ;;  %v1312_v54 = vld [vmem:[%s4011_s6 + $0xa] sm:$0xff] }
  0x6e   : > { %2617 = vmatmul.mubr.f32.gmra.mrb[14].mxu1 %v4282_v10  ;;  %3256 = vmatprep.subr.bf16.mxu0 %v3255_v4 }
  0x6f   : > { %2841 = vmatmul.mubr.f32.gmra.mrb[14].mxu0 %v4292_v14  ;;  %3130 = vmatpush3.bf16.msra.mxu1 %v3127_v2  ;;  %v2163_v2 = vld [vmem:[%s4906_s1 + $0x350] sm:$0xff] }
  0x70   : > { %3258 = vmatpush3.bf16.msra.mxu0 %v3255_v4  ;;  %2651 = vmatprep.mubr.f32.mxu1 %v236_v16  ;;  %v2164_v4 = vld [vmem:[%s4906_s1 + $0x358] sm:$0xff]  ;;  %v2165_v16 = vld [vmem:[%s4906_s1 + $0x360] sm:$0xff] }
  0x71   : > { %2875 = vmatprep.mubr.f32.mxu0 %v4104_v1  ;;  %3132 = vmatprep.subr.bf16.mxu1 %v3131_v17  ;;  %v3151_v12 = vpack.c.bf16 %v2164_v4, %v2163_v2  ;;  %v2237_v2 = vld [vmem:[%s4906_s1 + $0x2a0] sm:$0xff] }
  0x72   : > { %2652 = vmatmul.mubr.f32.vlgmr.msra.gmra.mrb[0].mxu1 %v237_v24  ;;  %3260 = vmatprep.subr.bf16.mxu0 %v3259_v20  ;;  %v4458_v4 = vld [vmem:[%s4011_s6 + $0x22] sm:$0xff] }
  0x73   : > { %2876 = vmatmul.mubr.f32.vlgmr.msra.gmra.mrb[0].mxu0 %v4124_v8  ;;  %3134 = vmatpush3.bf16.msra.mxu1 %v3131_v17  ;;  %v2166_v17 = vld [vmem:[%s4906_s1 + $0x368] sm:$0xff] }
  0x74   : > { %3262 = vmatpush3.bf16.msra.mxu0 %v3259_v20  ;;  %2654 = vmatprep.mubr.f32.mxu1 %v4020_v27  ;;  %v2223_v27 = vld [vmem:[%s4906_s1 + $0x130] sm:$0xff]  ;;  %v2229_v20 = vld [vmem:[%s4906_s1 + $0x160] sm:$0xff]  ;;  %v3155_v23 = vpack.c.bf16 %v2166_v17, %v2165_v16  ;;  %v2240_v16 = vld [vmem:[%s4906_s1 + $0x2b8] sm:$0xff] }
  0x75   : > { %2878 = vmatprep.mubr.f32.mxu0 %v4132_v11  ;;  %3136 = vmatprep.subr.bf16.mxu1 %v3135_v32  ;;  %v3283_v24 = vpack.c.bf16 %v2230_v22, %v2229_v20  ;;  %v4480_v17 = vld [vmem:[%s4011_s6 + $0x3a] sm:$0xff]  ;;  %v4485_v22 = vld [vmem:[%s4011_s6 + $0x4a] sm:$0xff] }
  0x76   : > { %2655 = vmatmul.mubr.f32.gmra.mrb[2].mxu1 %v4088_v59  ;;  %3264 = vmatprep.subr.bf16.mxu0 %v3263_v34  ;;  %v2224_v59 = vld [vmem:[%s4906_s1 + $0x138] sm:$0xff] }
  0x77   : > { %2879 = vmatmul.mubr.f32.gmra.mrb[2].mxu0 %v4152_v18  ;;  %3138 = vmatpush3.bf16.msra.mxu1 %v3135_v32  ;;  %v3271_v49 = vpack.c.bf16 %v2224_v59, %v2223_v27  ;;  %v2231_v32 = vld [vmem:[%s4906_s1 + $0x170] sm:$0xff] }
  0x78   : > { %3266 = vmatpush3.bf16.msra.mxu0 %v3263_v34  ;;  %2657 = vmatprep.mubr.f32.mxu1 %v4100_v63  ;;  %v2232_v34 = vld [vmem:[%s4906_s1 + $0x178] sm:$0xff]  ;;  %v2171_v59 = vld [vmem:[%s4906_s1 + $0x90] sm:$0xff] }
  0x79   : > { %2881 = vmatprep.mubr.f32.mxu0 %v4160_v21  ;;  %3140 = vmatprep.subr.bf16.mxu1 %v3139_v42  ;;  %v3287_v38 = vpack.c.bf16 %v2232_v34, %v2231_v32  ;;  %v4507_v34 = vld [vmem:[%s4011_s6 + $0x62] sm:$0xff] }
  0x7a   : > { %2658 = vmatmul.mubr.f32.gmra.mrb[4].mxu1 %v4114_v5  ;;  %3268 = vmatprep.subr.bf16.mxu0 %v3267_v44 }
  0x7b   : > { %2882 = vmatmul.mubr.f32.gmra.mrb[4].mxu0 %v4180_v29  ;;  %3142 = vmatpush3.bf16.msra.mxu1 %v3139_v42  ;;  %v2170_v42 = vld [vmem:[%s4906_s1 + $0x88] sm:$0xff] }
  0x7c   : > { %3270 = vmatpush3.bf16.msra.mxu0 %v3267_v44  ;;  %2660 = vmatprep.mubr.f32.mxu1 %v4128_v9  ;;  %v2234_v44 = vld [vmem:[%s4906_s1 + $0x288] sm:$0xff]  ;;  %v3163_v46 = vpack.c.bf16 %v2170_v42, %v2169_v39 }
  0x7d   : > { %2884 = vmatprep.mubr.f32.mxu0 %v4188_v33  ;;  %3144 = vmatprep.subr.bf16.mxu1 %v3143_v48  ;;  %v4524_v39 = vld [vmem:[%s4011_s6 + $0x6a] sm:$0xff] }
  0x7e   : > { %2661 = vmatmul.mubr.f32.gmra.mrb[6].mxu1 %v4142_v15  ;;  %3272 = vmatprep.subr.bf16.mxu0 %v3271_v49 }
  0x7f   : > { %2885 = vmatmul.mubr.f32.gmra.mrb[6].mxu0 %v4208_v40  ;;  %3146 = vmatpush3.bf16.msra.mxu1 %v3143_v48  ;;  %v2172_v48 = vld [vmem:[%s4906_s1 + $0x98] sm:$0xff] }
  0x80   : > { %3274 = vmatpush3.bf16.msra.mxu0 %v3271_v49  ;;  %2663 = vmatprep.mubr.f32.mxu1 %v4156_v19  ;;  %v2235_v49 = vld [vmem:[%s4906_s1 + $0x290] sm:$0xff]  ;;  %v3167_v55 = vpack.c.bf16 %v2172_v48, %v2171_v59 }
  0x81   : > { %2887 = vmatprep.mubr.f32.mxu0 %v4216_v43  ;;  %3148 = vmatprep.subr.bf16.mxu1 %v3147_v58  ;;  %v4551_v59 = vld [vmem:[%s4011_s6 + $0x92] sm:$0xff] }
  0x82   : > { %2664 = vmatmul.mubr.f32.gmra.mrb[8].mxu1 %v4170_v25  ;;  %3276 = vmatprep.subr.bf16.mxu0 %v3275_v60 }
  0x83   : > { %2888 = vmatmul.mubr.f32.gmra.mrb[8].mxu0 %v4236_v50  ;;  %3150 = vmatpush3.bf16.msra.mxu1 %v3147_v58  ;;  %v3295_v58 = vpack.c.bf16 %v2236_v52, %v2235_v49  ;;  %v2183_v49 = vld [vmem:[%s4906_s1 + $0xf0] sm:$0xff]  ;;  %v2248_v52 = vld [vmem:[%s4906_s1 + $0x2f8] sm:$0xff] }
  0x84   : > { %3278 = vmatpush3.bf16.msra.mxu0 %v3275_v60  ;;  %2666 = vmatprep.mubr.f32.mxu1 %v4184_v31  ;;  %v2173_v60 = vld [vmem:[%s4906_s1 + $0xa0] sm:$0xff] }
  0x85   : > { %2890 = vmatprep.mubr.f32.mxu0 %v4244_v53  ;;  %3152 = vmatprep.subr.bf16.mxu1 %v3151_v12 }
  0x86   : > { %2667 = vmatmul.mubr.f32.gmra.mrb[10].mxu1 %v4198_v37  ;;  %3280 = vmatprep.subr.bf16.mxu0 %v3279_v13 }
  0x87   : > { %2891 = vmatmul.mubr.f32.gmra.mrb[10].mxu0 %v4264_v61  ;;  %3154 = vmatpush3.bf16.msra.mxu1 %v3151_v12 }
  0x88   : > { %3282 = vmatpush3.bf16.msra.mxu0 %v3279_v13  ;;  %2669 = vmatprep.mubr.f32.mxu1 %v4212_v41  ;;  %v2175_v13 = vld [vmem:[%s4906_s1 + $0xb0] sm:$0xff] }
  0x89   : > { %2893 = vmatprep.mubr.f32.mxu0 %v4272_v3  ;;  %3156 = vmatprep.subr.bf16.mxu1 %v3155_v23  ;;  %v2233_v3 = vld [vmem:[%s4906_s1 + $0x280] sm:$0xff] }
  0x8a   : > { %2670 = vmatmul.mubr.f32.gmra.mrb[12].mxu1 %v4226_v47  ;;  %3284 = vmatprep.subr.bf16.mxu0 %v3283_v24  ;;  %v3291_v27 = vpack.c.bf16 %v2234_v44, %v2233_v3  ;;  %v4529_v3 = vld [vmem:[%s4011_s6 + $0x7a] sm:$0xff] }
  0x8b   : > { %2894 = vmatmul.mubr.f32.gmra.mrb[12].mxu0 %v4292_v14  ;;  %3158 = vmatpush3.bf16.msra.mxu1 %v3155_v23  ;;  %v1311_v14 = vld [vmem:[%s4011_s6 + $0x2] sm:$0xff] }
  0x8c   : > { %3286 = vmatpush3.bf16.msra.mxu0 %v3283_v24  ;;  %2672 = vmatprep.mubr.f32.mxu1 %v4240_v51  ;;  %v2177_v24 = vld [vmem:[%s4906_s1 + $0xc0] sm:$0xff] }
  0x8d   : > { %2896 = vmatprep.mubr.f32.mxu0 %v775_v36  ;;  %3160 = vmatprep.subr.bf16.mxu1 %v3159_v35  ;;  %v2179_v36 = vld [vmem:[%s4906_s1 + $0xd0] sm:$0xff] }
  0x8e   : > { %2673 = vmatmul.mubr.f32.gmra.mrb[14].mxu1 %v4254_v57  ;;  %3288 = vmatprep.subr.bf16.mxu0 %v3287_v38 }
  0x8f   : > { %2897 = vmatmul.mubr.f32.gmra.mrb[14].mxu0 %v776_v45  ;;  %3162 = vmatpush3.bf16.msra.mxu1 %v3159_v35  ;;  %v2181_v45 = vld [vmem:[%s4906_s1 + $0xe0] sm:$0xff] }
  0x90   : > { %3290 = vmatpush3.bf16.msra.mxu0 %v3287_v38  ;;  %2707 = vmatprep.mubr.f32.mxu1 %v4100_v63  ;;  %v2174_v63 = vld [vmem:[%s4906_s1 + $0xa8] sm:$0xff]  ;;  %v2244_v38 = vld [vmem:[%s4906_s1 + $0x2d8] sm:$0xff] }
  0x91   : > { %2931 = vmatprep.mubr.f32.mxu0 %v1311_v14  ;;  %3164 = vmatprep.subr.bf16.mxu1 %v3163_v46  ;;  %v3171_v6 = vpack.c.bf16 %v2174_v63, %v2173_v60  ;;  %v4546_v14 = vld [vmem:[%s4011_s6 + $0x82] sm:$0xff]  ;;  %v4574_v60 = vld [vmem:[%s4011_s6 + $0xaa] sm:$0xff] }
  0x92   : > { %2708 = vmatmul.mubr.f32.vlgmr.msra.gmra.mrb[0].mxu1 %v4114_v5  ;;  %3292 = vmatprep.subr.bf16.mxu0 %v3291_v27  ;;  %v2238_v5 = vld [vmem:[%s4906_s1 + $0x2a8] sm:$0xff] }
  0x93   : > { %2932 = vmatmul.mubr.f32.vlgmr.msra.gmra.mrb[0].mxu0 %v1312_v54  ;;  %3166 = vmatpush3.bf16.msra.mxu1 %v3163_v46  ;;  %v3299_v12 = vpack.c.bf16 %v2238_v5, %v2237_v2  ;;  %v2246_v46 = vld [vmem:[%s4906_s1 + $0x2e8] sm:$0xff]  ;;  %v4568_v54 = vld [vmem:[%s4011_s6 + $0x9a] sm:$0xff] }
  0x94   : > { %3294 = vmatpush3.bf16.msra.mxu0 %v3291_v27  ;;  %2710 = vmatprep.mubr.f32.mxu1 %v4128_v9  ;;  %v2176_v9 = vld [vmem:[%s4906_s1 + $0xb8] sm:$0xff]  ;;  %v2249_v2 = vld [vmem:[%s4906_s1 + $0x400] sm:$0xff] }
  0x95   : > { %2934 = vmatprep.mubr.f32.mxu0 %v4442_v56  ;;  %3168 = vmatprep.subr.bf16.mxu1 %v3167_v55  ;;  %v3175_v20 = vpack.c.bf16 %v2176_v9, %v2175_v13  ;;  %v255_v5 = vld [vmem:[%s4011_s6 + $0xe0] sm:$0xff]  ;;  %v2251_v13 = vld [vmem:[%s4906_s1 + $0x410] sm:$0xff]  ;;  %v2252_v9 = vld [vmem:[%s4906_s1 + $0x418] sm:$0xff] }
  0x96   : > { %2711 = vmatmul.mubr.f32.gmra.mrb[2].mxu1 %v4142_v15  ;;  %3296 = vmatprep.subr.bf16.mxu0 %v3295_v58  ;;  %v2239_v15 = vld [vmem:[%s4906_s1 + $0x2b0] sm:$0xff] }
  0x97   : > { %2935 = vmatmul.mubr.f32.gmra.mrb[2].mxu0 %v4458_v4  ;;  %3170 = vmatpush3.bf16.msra.mxu1 %v3167_v55  ;;  %v3303_v23 = vpack.c.bf16 %v2240_v16, %v2239_v15  ;;  %v254_v55 = vld [vmem:[%s4011_s6 + $0xd8] sm:$0xff]  ;;  %v758_v15 = vld [vmem:[%s4011_s6 + $0x9] sm:$0xff]  ;;  %v3327_v16 = vpack.c.bf16 %v2252_v9, %v2251_v13 }
  0x98   : > { %3298 = vmatpush3.bf16.msra.mxu0 %v3295_v58  ;;  %2713 = vmatprep.mubr.f32.mxu1 %v4156_v19  ;;  %v2178_v19 = vld [vmem:[%s4906_s1 + $0xc8] sm:$0xff] }
  0x99   : > { %2937 = vmatprep.mubr.f32.mxu0 %v4463_v7  ;;  %3172 = vmatprep.subr.bf16.mxu1 %v3171_v6  ;;  %v3179_v32 = vpack.c.bf16 %v2178_v19, %v2177_v24  ;;  %v2255_v24 = vld [vmem:[%s4906_s1 + $0x430] sm:$0xff]  ;;  %v2256_v19 = vld [vmem:[%s4906_s1 + $0x438] sm:$0xff] }
  0x9a   : > { %2714 = vmatmul.mubr.f32.gmra.mrb[4].mxu1 %v4170_v25  ;;  %3300 = vmatprep.subr.bf16.mxu0 %v3299_v12  ;;  %v2241_v25 = vld [vmem:[%s4906_s1 + $0x2c0] sm:$0xff] }
  0x9b   : > { %2938 = vmatmul.mubr.f32.gmra.mrb[4].mxu0 %v4480_v17  ;;  %3174 = vmatpush3.bf16.msra.mxu1 %v3171_v6  ;;  %v3307_v35 = vpack.c.bf16 %v2242_v26, %v2241_v25  ;;  %v757_v6 = vld [vmem:[%s4011_s6 + $0x1] sm:$0xff]  ;;  %v2260_v25 = vld [vmem:[%s4906_s1 + $0x458] sm:$0xff] }
  0x9c   : > { %3302 = vmatpush3.bf16.msra.mxu0 %v3299_v12  ;;  %2716 = vmatprep.mubr.f32.mxu1 %v4184_v31  ;;  %v2180_v31 = vld [vmem:[%s4906_s1 + $0xd8] sm:$0xff]  ;;  %v2262_v26 = vld [vmem:[%s4906_s1 + $0x468] sm:$0xff] }
  0x9d   : > { %2940 = vmatprep.mubr.f32.mxu0 %v4485_v22  ;;  %3176 = vmatprep.subr.bf16.mxu1 %v3175_v20  ;;  %v3183_v42 = vpack.c.bf16 %v2180_v31, %v2179_v36 }
  0x9e   : > { %2717 = vmatmul.mubr.f32.gmra.mrb[6].mxu1 %v4198_v37  ;;  %3304 = vmatprep.subr.bf16.mxu0 %v3303_v23  ;;  %v2243_v37 = vld [vmem:[%s4906_s1 + $0x2d0] sm:$0xff] }
  0x9f   : > { %2941 = vmatmul.mubr.f32.gmra.mrb[6].mxu0 %v4502_v28  ;;  %3178 = vmatpush3.bf16.msra.mxu1 %v3175_v20  ;;  %v3311_v44 = vpack.c.bf16 %v2244_v38, %v2243_v37  ;;  %v2253_v20 = vld [vmem:[%s4906_s1 + $0x420] sm:$0xff] }
  0xa0   : > { %3306 = vmatpush3.bf16.msra.mxu0 %v3303_v23  ;;  %2719 = vmatprep.mubr.f32.mxu1 %v4212_v41  ;;  %v2182_v41 = vld [vmem:[%s4906_s1 + $0xe8] sm:$0xff] }
  0xa1   : > { %2943 = vmatprep.mubr.f32.mxu0 %v4507_v34  ;;  %3180 = vmatprep.subr.bf16.mxu1 %v3179_v32  ;;  %v3187_v27 = vpack.c.bf16 %v2182_v41, %v2181_v45  ;;  %v2254_v23 = vld [vmem:[%s4906_s1 + $0x428] sm:$0xff] }
  0xa2   : > { %2720 = vmatmul.mubr.f32.gmra.mrb[8].mxu1 %v4226_v47  ;;  %3308 = vmatprep.subr.bf16.mxu0 %v3307_v35  ;;  %v2245_v47 = vld [vmem:[%s4906_s1 + $0x2e0] sm:$0xff] }
  0xa3   : > { %2944 = vmatmul.mubr.f32.gmra.mrb[8].mxu0 %v4524_v39  ;;  %3182 = vmatpush3.bf16.msra.mxu1 %v3179_v32  ;;  %v3315_v48 = vpack.c.bf16 %v2246_v46, %v2245_v47  ;;  %v2264_v32 = vld [vmem:[%s4906_s1 + $0x478] sm:$0xff] }
  0xa4   : > { %3310 = vmatpush3.bf16.msra.mxu0 %v3307_v35  ;;  %2722 = vmatprep.mubr.f32.mxu1 %v4240_v51  ;;  %v2184_v51 = vld [vmem:[%s4906_s1 + $0xf8] sm:$0xff]  ;;  %v1328_v35 = vld [vmem:[%s4011_s6 + $0xca] sm:$0xff] }
  0xa5   : > { %2946 = vmatprep.mubr.f32.mxu0 %v4529_v3  ;;  %3184 = vmatprep.subr.bf16.mxu1 %v3183_v42  ;;  %v3191_v58 = vpack.c.bf16 %v2184_v51, %v2183_v49 }
  0xa6   : > { %2723 = vmatmul.mubr.f32.gmra.mrb[10].mxu1 %v4254_v57  ;;  %3312 = vmatprep.subr.bf16.mxu0 %v3311_v44  ;;  %v2247_v57 = vld [vmem:[%s4906_s1 + $0x2f0] sm:$0xff] }
  0xa7   : > { %2947 = vmatmul.mubr.f32.gmra.mrb[10].mxu0 %v4546_v14  ;;  %3186 = vmatpush3.bf16.msra.mxu1 %v3183_v42  ;;  %v3319_v63 = vpack.c.bf16 %v2248_v52, %v2247_v57 }
  0xa8   : > { %3314 = vmatpush3.bf16.msra.mxu0 %v3311_v44  ;;  %2725 = vmatprep.mubr.f32.mxu1 %v4268_v0  ;;  %v2250_v0 = vld [vmem:[%s4906_s1 + $0x408] sm:$0xff] }
  0xa9   : > { %2949 = vmatprep.mubr.f32.mxu0 %v4551_v59  ;;  %3188 = vmatprep.subr.bf16.mxu1 %v3187_v27  ;;  %v3323_v12 = vpack.c.bf16 %v2250_v0, %v2249_v2 }
  0xaa   : > { %2726 = vmatmul.mubr.f32.gmra.mrb[12].mxu1 %v4282_v10  ;;  %3316 = vmatprep.subr.bf16.mxu0 %v3315_v48  ;;  %v4585_v10 = vld [vmem:[%s4011_s6 + $0xb2] sm:$0xff] }
  0xab   : > { %2950 = vmatmul.mubr.f32.gmra.mrb[12].mxu0 %v4568_v54  ;;  %3190 = vmatpush3.bf16.msra.mxu1 %v3187_v27 }
  0xac   : > { %3318 = vmatpush3.bf16.msra.mxu0 %v3315_v48  ;;  %2728 = vmatprep.mubr.f32.mxu1 %v254_v55 }
  0xad   : > { %2952 = vmatprep.mubr.f32.mxu0 %v4574_v60  ;;  %3192 = vmatprep.subr.bf16.mxu1 %v3191_v58 }
  0xae   : > { %2729 = vmatmul.mubr.f32.gmra.mrb[14].mxu1 %v255_v5  ;;  %3320 = vmatprep.subr.bf16.mxu0 %v3319_v63 }
  0xaf   : > { %2953 = vmatmul.mubr.f32.gmra.mrb[14].mxu0 %v4585_v10  ;;  %3194 = vmatpush3.bf16.msra.mxu1 %v3191_v58 }
  0xb0   : > { %3322 = vmatpush3.bf16.msra.mxu0 %v3319_v63  ;;  %2763 = vmatprep.mubr.f32.mxu1 %v757_v6 }
  0xb1   : > { %2987 = vmatprep.mubr.f32.mxu0 %v4442_v56  ;;  %3324 = vmatprep.subr.bf16.mxu0 %v3323_v12  ;;  %v3331_v56 = vpack.c.bf16 %v2254_v23, %v2253_v20 }
  0xb2   : > { %2764 = vmatmul.mubr.f32.vlgmr.msra.gmra.mrb[0].mxu1 %v758_v15  ;;  %3355 = vmatprep.subr.bf16.mxu1 %v3323_v12 }
  0xb3   : > { %2988 = vmatmul.mubr.f32.vlgmr.msra.gmra.mrb[0].mxu0 %v4458_v4  ;;  %3363 = vmatpush3.bf16.msra.mxu1 %v3323_v12  ;;  %v2258_v4 = vld [vmem:[%s4906_s1 + $0x448] sm:$0xff] }
  0xb4   : > { %3326 = vmatpush3.bf16.msra.mxu0 %v3323_v12  ;;  %2766 = vmatprep.mubr.f32.mxu1 %v4030_v30  ;;  %v3335_v30 = vpack.c.bf16 %v2256_v19, %v2255_v24 }
  0xb5   : > { %2990 = vmatprep.mubr.f32.mxu0 %v4463_v7  ;;  %3328 = vmatprep.subr.bf16.mxu0 %v3327_v16 }
  0xb6   : > { %2767 = vmatmul.mubr.f32.gmra.mrb[2].mxu1 %v4097_v62  ;;  %3356 = vmatprep.subr.bf16.mxu1 %v3327_v16  ;;  %v2257_v62 = vld [vmem:[%s4906_s1 + $0x440] sm:$0xff] }
  0xb7   : > { %2991 = vmatmul.mubr.f32.gmra.mrb[2].mxu0 %v4480_v17  ;;  %3364 = vmatpush3.bf16.msra.mxu1 %v3327_v16 }
  0xb8   : > { %3330 = vmatpush3.bf16.msra.mxu0 %v3327_v16  ;;  %2769 = vmatprep.mubr.f32.mxu1 %v4104_v1  ;;  %v3339_v1 = vpack.c.bf16 %v2258_v4, %v2257_v62 }
  0xb9   : > { %2993 = vmatprep.mubr.f32.mxu0 %v4485_v22  ;;  %3332 = vmatprep.subr.bf16.mxu0 %v3331_v56 }
  0xba   : > { %2770 = vmatmul.mubr.f32.gmra.mrb[4].mxu1 %v4124_v8  ;;  %3357 = vmatprep.subr.bf16.mxu1 %v3331_v56  ;;  %v2259_v8 = vld [vmem:[%s4906_s1 + $0x450] sm:$0xff] }
  0xbb   : > { %2994 = vmatmul.mubr.f32.gmra.mrb[4].mxu0 %v4502_v28  ;;  %3365 = vmatpush3.bf16.msra.mxu1 %v3331_v56 }
  0xbc   : > { %3334 = vmatpush3.bf16.msra.mxu0 %v3331_v56  ;;  %2772 = vmatprep.mubr.f32.mxu1 %v4132_v11  ;;  %v3343_v11 = vpack.c.bf16 %v2260_v25, %v2259_v8 }
  0xbd   : > { %2996 = vmatprep.mubr.f32.mxu0 %v4507_v34  ;;  %3336 = vmatprep.subr.bf16.mxu0 %v3335_v30 }
  0xbe   : > { %2773 = vmatmul.mubr.f32.gmra.mrb[6].mxu1 %v4152_v18  ;;  %3358 = vmatprep.subr.bf16.mxu1 %v3335_v30  ;;  %v2261_v18 = vld [vmem:[%s4906_s1 + $0x460] sm:$0xff] }
  0xbf   : > { %2997 = vmatmul.mubr.f32.gmra.mrb[6].mxu0 %v4524_v39  ;;  %3366 = vmatpush3.bf16.msra.mxu1 %v3335_v30 }
  0xc0   : > { %3338 = vmatpush3.bf16.msra.mxu0 %v3335_v30  ;;  %2775 = vmatprep.mubr.f32.mxu1 %v4160_v21  ;;  %v3347_v21 = vpack.c.bf16 %v2262_v26, %v2261_v18 }
  0xc1   : > { %2999 = vmatprep.mubr.f32.mxu0 %v4529_v3  ;;  %3340 = vmatprep.subr.bf16.mxu0 %v3339_v1 }
  0xc2   : > { %2776 = vmatmul.mubr.f32.gmra.mrb[8].mxu1 %v4180_v29  ;;  %3359 = vmatprep.subr.bf16.mxu1 %v3339_v1  ;;  %v2263_v29 = vld [vmem:[%s4906_s1 + $0x470] sm:$0xff] }
  0xc3   : > { %3000 = vmatmul.mubr.f32.gmra.mrb[8].mxu0 %v4546_v14  ;;  %3367 = vmatpush3.bf16.msra.mxu1 %v3339_v1 }
  0xc4   : > { %3342 = vmatpush3.bf16.msra.mxu0 %v3339_v1  ;;  %2778 = vmatprep.mubr.f32.mxu1 %v4188_v33  ;;  %v3351_v33 = vpack.c.bf16 %v2264_v32, %v2263_v29 }
  0xc5   : > { %3002 = vmatprep.mubr.f32.mxu0 %v4551_v59  ;;  %3344 = vmatprep.subr.bf16.mxu0 %v3343_v11 }
  0xc6   : > { %2779 = vmatmul.mubr.f32.gmra.mrb[10].mxu1 %v4208_v40  ;;  %3360 = vmatprep.subr.bf16.mxu1 %v3343_v11  ;;  %v1327_v40 = vld [vmem:[%s4011_s6 + $0xc2] sm:$0xff] }
  0xc7   : > { %3003 = vmatmul.mubr.f32.gmra.mrb[10].mxu0 %v4568_v54  ;;  %3368 = vmatpush3.bf16.msra.mxu1 %v3343_v11 }
  0xc8   : > { %3346 = vmatpush3.bf16.msra.mxu0 %v3343_v11  ;;  %2781 = vmatprep.mubr.f32.mxu1 %v4216_v43  ;;  %v1329_v43 = vld [vmem:[%s4011_s6 + $0xda] sm:$0xff] }
  0xc9   : > { %3005 = vmatprep.mubr.f32.mxu0 %v4574_v60  ;;  %3348 = vmatprep.subr.bf16.mxu0 %v3347_v21 }
  0xca   : > { %2782 = vmatmul.mubr.f32.gmra.mrb[12].mxu1 %v4236_v50  ;;  %3361 = vmatprep.subr.bf16.mxu1 %v3347_v21  ;;  %v1330_v50 = vld [vmem:[%s4011_s6 + $0xe2] sm:$0xff]  ;;  %s2274_s6 = sshll.u32 %s3770_s21, 4 }
  0xcb   : > { %3006 = vmatmul.mubr.f32.gmra.mrb[12].mxu0 %v4585_v10  ;;  %3369 = vmatpush3.bf16.msra.mxu1 %v3347_v21  ;;  %s4706_s15 = sadd.s32 %s2274_s6, %s2268_s27  ;;  %s3612_s6 = sshll.u32 %s3789_s9, 4  ;;  %s3613_s6 = int_to_ptr.vmem [resolvable:$false] %s3612_s6 }
  0xcc   : > { %3350 = vmatpush3.bf16.msra.mxu0 %v3347_v21  ;;  %2784 = vmatprep.mubr.f32.mxu1 %v4244_v53  ;;  %s2269_s21 = sshll.u32 %s4706_s15, 7  ;;  %s3614_s27 = scalar_lea.vmem %s3613_s6, 4096 }
  0xcd   : > { %3008 = vmatprep.mubr.f32.mxu0 %v1327_v40  ;;  %3352 = vmatprep.subr.bf16.mxu0 %v3351_v33  ;;  %s4731_s0 = scalar_lea.hbm %s4907_s2, %s2269_s21  ;;  %p3615_p10 = scmp.lt.s32.totalorder %s4733_s30, %s3613_s6 }
  0xce   : > { %2785 = vmatmul.mubr.f32.gmra.mrb[14].mxu1 %v4264_v61  ;;  %3362 = vmatprep.subr.bf16.mxu1 %v3351_v33  ;;  %p3616_p11 = scmp.lt.s32.totalorder %s3614_s27, %s3608_s12 }
  0xcf   : > { %3009 = vmatmul.mubr.f32.gmra.mrb[14].mxu0 %v1328_v35  ;;  %3370 = vmatpush3.bf16.msra.mxu1 %v3351_v33 }
  0xd0   : > { %3354 = vmatpush3.bf16.msra.mxu0 %v3351_v33  ;;  %3043 = vmatprep.mubr.f32.mxu0 %v4463_v7  ;;  %p3617_p0 = por %p3616_p11, %p3615_p10 }
  0xd1   : > { %3055 = vmatprep.mubr.f32.mxu1 %v4551_v59 }
  0xd2   : > { %3056 = vmatmul.mubr.f32.vlgmr.msra.gmra.mrb[16].mxu1 %v4568_v54  ;;  %p3618_p1 = pnand %p3617_p0, %p3611_p9 }
  0xd3   : > { %3044 = vmatmul.mubr.f32.vlgmr.msra.gmra.mrb[0].mxu0 %v4480_v17  ;;  %3058 = vmatprep.mubr.f32.mxu1 %v4574_v60 }
  0xd4   : > { %3046 = vmatprep.mubr.f32.mxu0 %v4485_v22 }
  0xd6   : > { %3059 = vmatmul.mubr.f32.gmra.mrb[18].mxu1 %v4585_v10 }
  0xd7   : > { %3047 = vmatmul.mubr.f32.gmra.mrb[2].mxu0 %v4502_v28  ;;  %3061 = vmatprep.mubr.f32.mxu1 %v1327_v40 }
  0xd8   : > { %3049 = vmatprep.mubr.f32.mxu0 %v4507_v34 }
  0xda   : > { %3062 = vmatmul.mubr.f32.gmra.mrb[20].mxu1 %v1328_v35 }
  0xdb   : > { %3050 = vmatmul.mubr.f32.gmra.mrb[4].mxu0 %v4524_v39  ;;  %3064 = vmatprep.mubr.f32.mxu1 %v1329_v43 }
  0xdc   : > { %3052 = vmatprep.mubr.f32.mxu0 %v4529_v3 }
  0xde   : > { %3065 = vmatmul.mubr.f32.gmra.mrb[22].mxu1 %v1330_v50 }
  0xdf   : > { %3053 = vmatmul.mubr.f32.gmra.mrb[6].mxu0 %v4546_v14 }
 0x185   : > { %v2765_v53 = vpop.f32.mrb[0].mxu1 }
 0x186   : > { %v860_v61 = vpop.f32.mrb[1].mxu1 }
 0x189   : > { %v2768_v7 = vpop.f32.mrb[2].mxu1 }
 0x18a   : > { %v870_v17 = vpop.f32.mrb[3].mxu1 }
 0x18d   : > { %v4677_v22 = vpop.f32.mrb[4].mxu1 }
 0x18e   : > { %v4679_v28 = vpop.f32.mrb[5].mxu1 }
 0x191   : > { %v4681_v34 = vpop.f32.mrb[6].mxu1 }
 0x192   : > { %v4683_v36 = vpop.f32.mrb[7].mxu1 }
 0x195   : > { %v2777_v31 = vpop.f32.mrb[8].mxu1 }
 0x196   : > { %v3001_v37 = vpop.f32.mrb[8].mxu0  ;;  %v900_v38 = vpop.f32.mrb[9].mxu1 }
 0x197   : > { %v3379_v39 = vadd.f32 %v3001_v37, %v2777_v31  ;;  %v1632_v42 = vpop.f32.mrb[9].mxu0 }
 0x198   : > { %v3381_v3 = vadd.f32 %v1632_v42, %v900_v38 }
 0x199   : > { %v2780_v44 = vpop.f32.mrb[10].mxu1 }
 0x19a   : > { %v3004_v45 = vpop.f32.mrb[10].mxu0  ;;  %v910_v41 = vpop.f32.mrb[11].mxu1 }
 0x19b   : > { %v3383_v47 = vadd.f32 %v3004_v45, %v2780_v44  ;;  %v1642_v46 = vpop.f32.mrb[11].mxu0 }
 0x19c   : > { %v3385_v14 = vadd.f32 %v1642_v46, %v910_v41 }
 0x19d   : > { %v2783_v27 = vpop.f32.mrb[12].mxu1 }
 0x19e   : > { %v3007_v59 = vpop.f32.mrb[12].mxu0  ;;  %v920_v48 = vpop.f32.mrb[13].mxu1 }
 0x19f   : > { %v3387_v49 = vadd.f32 %v3007_v59, %v2783_v27  ;;  %v1652_v51 = vpop.f32.mrb[13].mxu0 }
 0x1a0   : > { %v3389_v57 = vadd.f32 %v1652_v51, %v920_v48 }
 0x1a1   : > { %v2786_v52 = vpop.f32.mrb[14].mxu1 }
 0x1a2   : > { %v3010_v54 = vpop.f32.mrb[14].mxu0  ;;  %v930_v55 = vpop.f32.mrb[15].mxu1 }
 0x1a3   : > { %v3391_v58 = vadd.f32 %v3010_v54, %v2786_v52  ;;  %v1662_v60 = vpop.f32.mrb[15].mxu0 }
 0x1a4   : > { %v3393_v63 = vadd.f32 %v1662_v60, %v930_v55 }
 0x1a5   : > { %v3057_v2 = vpop.f32.mrb[16].mxu1 }
 0x1a6   : > { %v3045_v0 = vpop.f32.mrb[0].mxu0  ;;  %v4685_v5 = vadd.f32 %v3379_v39, %v3057_v2  ;;  %v1810_v10 = vpop.f32.mrb[17].mxu1 }
 0x1a7   : > { %v3371_v6 = vadd.f32 %v3045_v0, %v2765_v53  ;;  %v1770_v12 = vpop.f32.mrb[1].mxu0  ;;  %v4687_v13 = vadd.f32 %v3381_v3, %v1810_v10 }
 0x1a8   : > { %1874 = vst [vmem:[%s3952_s29 + $0x48] sm:$0xff] %v4685_v5  ;;  %v3372_v9 = vadd.f32 %v1770_v12, %v860_v61 }
 0x1a9   : > { %1866 = vst [vmem:[%s3952_s29 + $0x8] sm:$0xff] %v3371_v6  ;;  %v1907_v15 = vmul.f32 %v3371_v6, %v3371_v6  ;;  %1873 = vst [vmem:[%s3952_s29 + $0x40] sm:$0xff] %v4687_v13  ;;  %v3060_v16 = vpop.f32.mrb[18].mxu1 }
 0x1aa   : > { %1865 = vst [vmem:[%s3952_s29] sm:$0xff] %v3372_v9  ;;  %v1882_v20 = vadd.f32 %v3372_v9, %v3371_v6  ;;  %v1906_v23 = vmul.f32 %v3372_v9, %v3372_v9  ;;  %v3048_v56 = vpop.f32.mrb[2].mxu0  ;;  %v4695_v24 = vadd.f32 %v3383_v47, %v3060_v16  ;;  %v1820_v19 = vpop.f32.mrb[19].mxu1 }
 0x1ab   : > { %v3373_v30 = vadd.f32 %v3048_v56, %v2768_v7  ;;  %v1780_v62 = vpop.f32.mrb[3].mxu0  ;;  %v4699_v4 = vadd.f32 %v3385_v14, %v1820_v19 }
 0x1ac   : > { %v1922_v1 = vadd.f32 %v1907_v15, %v1906_v23  ;;  %1876 = vst [vmem:[%s3952_s29 + $0x58] sm:$0xff] %v4695_v24  ;;  %v3374_v8 = vadd.f32 %v1780_v62, %v870_v17 }
 0x1ad   : > { %1868 = vst [vmem:[%s3952_s29 + $0x18] sm:$0xff] %v3373_v30  ;;  %1875 = vst [vmem:[%s3952_s29 + $0x50] sm:$0xff] %v4699_v4  ;;  %v3063_v25 = vpop.f32.mrb[20].mxu1  ;;  %v1909_v35 = vmul.f32 %v3373_v30, %v3373_v30 }
 0x1ae   : > { %1867 = vst [vmem:[%s3952_s29 + $0x10] sm:$0xff] %v3374_v8  ;;  %v1883_v11 = vadd.f32 %v3374_v8, %v1882_v20  ;;  %v1908_v18 = vmul.f32 %v3374_v8, %v3374_v8  ;;  %v3051_v26 = vpop.f32.mrb[4].mxu0  ;;  %v4709_v21 = vadd.f32 %v3387_v49, %v3063_v25  ;;  %v1830_v29 = vpop.f32.mrb[21].mxu1 }
 0x1af   : > { %v3375_v32 = vadd.f32 %v3051_v26, %v4677_v22  ;;  %v1790_v33 = vpop.f32.mrb[5].mxu0  ;;  %v4712_v40 = vadd.f32 %v3389_v57, %v1830_v29 }
 0x1b0   : > { %v1923_v43 = vadd.f32 %v1922_v1, %v1908_v18  ;;  %1878 = vst [vmem:[%s3952_s29 + $0x68] sm:$0xff] %v4709_v21  ;;  %v3376_v50 = vadd.f32 %v1790_v33, %v4679_v28  ;;  %v1884_v53 = vadd.f32 %v3373_v30, %v1883_v11 }
 0x1b1   : > { %1870 = vst [vmem:[%s3952_s29 + $0x28] sm:$0xff] %v3375_v32  ;;  %1877 = vst [vmem:[%s3952_s29 + $0x60] sm:$0xff] %v4712_v40  ;;  %v3066_v61 = vpop.f32.mrb[22].mxu1  ;;  %v1911_v3 = vmul.f32 %v3375_v32, %v3375_v32 }
 0x1b2   : > { %1869 = vst [vmem:[%s3952_s29 + $0x20] sm:$0xff] %v3376_v50  ;;  %v1885_v7 = vadd.f32 %v3376_v50, %v1884_v53  ;;  %v1910_v17 = vmul.f32 %v3376_v50, %v3376_v50  ;;  %v1924_v22 = vadd.f32 %v1923_v43, %v1909_v35  ;;  %v3054_v31 = vpop.f32.mrb[6].mxu0  ;;  %v4723_v37 = vadd.f32 %v3391_v58, %v3066_v61  ;;  %v1840_v38 = vpop.f32.mrb[23].mxu1 }
 0x1b3   : > { %v3377_v28 = vadd.f32 %v3054_v31, %v4681_v34  ;;  %v1800_v39 = vpop.f32.mrb[7].mxu0  ;;  %v4726_v42 = vadd.f32 %v3393_v63, %v1840_v38 }
 0x1b4   : > { %v1925_v44 = vadd.f32 %v1924_v22, %v1910_v17  ;;  %1880 = vst [vmem:[%s3952_s29 + $0x78] sm:$0xff] %v4723_v37  ;;  %v3378_v34 = vadd.f32 %v1800_v39, %v4683_v36  ;;  %v1886_v45 = vadd.f32 %v3375_v32, %v1885_v7 }
 0x1b5   : > { %1872 = vst [vmem:[%s3952_s29 + $0x38] sm:$0xff] %v3377_v28  ;;  %1879 = vst [vmem:[%s3952_s29 + $0x70] sm:$0xff] %v4726_v42 }
 0x1b6   : > { %1871 = vst [vmem:[%s3952_s29 + $0x30] sm:$0xff] %v3378_v34  ;;  %v1887_v41 = vadd.f32 %v3378_v34, %v1886_v45  ;;  %v1912_v47 = vmul.f32 %v3378_v34, %v3378_v34  ;;  %v1926_v46 = vadd.f32 %v1925_v44, %v1911_v3 }
 0x1b7   : > { %3621 = shalt.err (!%p3618_p1)
}
 0x1b8   : > { %s3622_s29 = scalar_lea.hbm %s4731_s0, 2048  ;;  %s3626_s8 = scalar_lea.hbm %s4907_s2, 8192 }
 0x1b9   : > { %p3623_p4 = scmp.ne.s32.totalorder %s4731_s0, %s3622_s29  ;;  %p3627_p6 = scmp.lt.u32.totalorder %s4731_s0, %s4907_s2 }
 0x1ba   : > { %p3628_p8 = scmp.lt.u32.totalorder %s3626_s8, %s3622_s29  ;;  %p3630_p10 = scmp.lt.u32.totalorder %s3622_s29, %s4731_s0 }
 0x1bb   : > { %p3624_p2 = pnand %p3623_p4, %p3894_p3 }
 0x1bc   : > { %p3629_p9 = por %p3628_p8, %p3627_p6 }
 0x1bd   : > { %p3625_p5 = pneg %p3624_p2 }
 0x1be   : > { %p3631_p11 = por %p3630_p10, %p3629_p9 }
 0x1c0   : > { %p3632_p0 = pnand %p3631_p11, %p3625_p5 }
 0x1c2   : > { %3635 = shalt.err (!%p3632_p0)
}
 0x1c3   : > { %s3790_s12 = smov 128   ;;  %s3791_s9 = smov 8   ;;  %v1913_v36 = vmul.f32 %v3377_v28, %v3377_v28  ;;  %v1888_v14 = vadd.f32 %v3377_v28, %v1887_v41  ;;  %v1927_v27 = vadd.f32 %v1926_v46, %v1912_v47  ;;  %v1914_v59 = vmul.f32 %v4687_v13, %v4687_v13  ;;  %v1881_v26 = vld [vmem:[%s3954_s28] sm:$0x1] }
 0x1c4   : > { %3500 = dma.vmem_to_hbm [thread:$0]  (%p3894_p3), %s4733_s30, 2048, %s4731_s0, %s4744_s23, %s3790_s12, %s3790_s12, %s3791_s9   ;;  %v1915_v51 = vmul.f32 %v4685_v5, %v4685_v5  ;;  %v1916_v54 = vmul.f32 %v4699_v4, %v4699_v4  ;;  %v1917_v60 = vmul.f32 %v4695_v24, %v4695_v24  ;;  %v1918_v0 = vmul.f32 %v4712_v40, %v4712_v40 }
 0x1c5   : > { %v1889_v48 = vadd.f32 %v4687_v13, %v1888_v14  ;;  %v1928_v49 = vadd.f32 %v1927_v27, %v1913_v36  ;;  %v1920_v15 = vmul.f32 %v4726_v42, %v4726_v42  ;;  %v1921_v20 = vmul.f32 %v4723_v37, %v4723_v37  ;;  %s4931_s7 = sadd.s32 4294967295, %s3786_s25   ;;  %s2270_s0 = sshll.u32 %s3774_s22, 4  ;;  %v1905_v32 = vld [vmem:[%s3956_s24] sm:$0x1] }
 0x1c6   : > { %s4794_s30 = sand.u32 1, %s4931_s7   ;;  %s1986_s23 = sshll.u32 %s3954_s28, 4  ;;  %s4806_s23 = int_to_ptr.vmem [resolvable:$true] %s1986_s23 }
 0x1c7   : > { %v1890_v57 = vadd.f32 %v4685_v5, %v1889_v48  ;;  %v1929_v52 = vadd.f32 %v1928_v49, %v1914_v59  ;;  %v1919_v5 = vmul.f32 %v4709_v21, %v4709_v21  ;;  %s1999_s6 = sshll.u32 %s3956_s24, 4  ;;  %s4804_s15 = scalar_lea.hbm %s4908_s3, %s2270_s0  ;;  %s4814_s6 = int_to_ptr.vmem [resolvable:$true] %s1999_s6 }
 0x1c8   : > { %s4812_s8 = scalar_lea.hbm %s4909_s4, %s2270_s0  ;;  %s1951_s5 = scalar_lea.sflag [#allocation5], %s4794_s30 }
 0x1c9   : > { %v1930_v55 = vadd.f32 %v1929_v52, %v1915_v51  ;;  %v1891_v58 = vadd.f32 %v4699_v4, %v1890_v57  ;;  %s3636_s11 = scalar_lea.vmem %s4806_s23, 16  ;;  %s3792_s12 = smov [#allocation4]  }
 0x1ca   : > { %p3637_p3 = scmp.ne.s32.totalorder %s4806_s23, %s3636_s11  ;;  %s3640_s9 = sshll.u32 %s3792_s12, 4  ;;  %s3641_s9 = int_to_ptr.vmem [resolvable:$false] %s3640_s9 }
 0x1cb   : > { %v1892_v63 = vadd.f32 %v4695_v24, %v1891_v58  ;;  %v1931_v2 = vadd.f32 %v1930_v55, %v1916_v54  ;;  %s3642_s7 = scalar_lea.vmem %s3641_s9, 32  ;;  %p3643_p2 = scmp.lt.s32.totalorder %s4806_s23, %s3641_s9 }
 0x1cc   : > { %p3638_p1 = pnand %p3637_p3, %p3923_p12  ;;  %p3644_p5 = scmp.lt.s32.totalorder %s3642_s7, %s3636_s11 }
 0x1cd   : > { %v1893_v10 = vadd.f32 %v4712_v40, %v1892_v63  ;;  %v1932_v6 = vadd.f32 %v1931_v2, %v1917_v60 }
 0x1ce   : > { %p3639_p4 = pneg %p3638_p1  ;;  %p3645_p6 = por %p3644_p5, %p3643_p2 }
 0x1cf   : > { %v1894_v12 = vadd.f32 %v4709_v21, %v1893_v10  ;;  %v1933_v13 = vadd.f32 %v1932_v6, %v1918_v0 }
 0x1d0   : > { %p3646_p8 = pnand %p3645_p6, %p3639_p4 }
 0x1d1   : > { %v1895_v9 = vadd.f32 %v4726_v42, %v1894_v12  ;;  %v1934_v16 = vadd.f32 %v1933_v13, %v1919_v5 }
 0x1d3   : > { %v1896_v23 = vadd.f32 %v4723_v37, %v1895_v9  ;;  %v1935_v56 = vadd.f32 %v1934_v16, %v1920_v15 }
 0x1d5   : > { %v1897_v24 = vrot.slane %v1896_v23, 4  ;;  %v1936_v19 = vadd.f32 %v1935_v56, %v1921_v20 }
 0x1d7   : > { %v1898_v30 = vadd.f32 %v1897_v24, %v1896_v23  ;;  %v1937_v62 = vrot.slane %v1936_v19, 4 }
 0x1d9   : > { %v1899_v4 = vrot.slane %v1898_v30, 2  ;;  %v1938_v1 = vadd.f32 %v1937_v62, %v1936_v19 }
 0x1db   : > { %v1939_v8 = vrot.slane %v1938_v1, 2  ;;  %v1900_v25 = vadd.f32 %v1899_v4, %v1898_v30 }
 0x1dd   : > { %v1901_v11 = vrot.slane %v1900_v25, 1  ;;  %v1940_v18 = vadd.f32 %v1939_v8, %v1938_v1 }
 0x1df   : > { %v1902_v21 = vadd.f32 %v1901_v11, %v1900_v25  ;;  %v1941_v29 = vrot.slane %v1940_v18, 1 }
 0x1e1   : > { %v1903_v33 = vadd.f32 %v1902_v21, %v1881_v26  ;;  %v1942_v40 = vadd.f32 %v1941_v29, %v1940_v18 }
 0x1e3   : > { %1904 = vst [vmem:[%s3954_s28] sm:$0x1] %v1903_v33  ;;  %v1943_v35 = vadd.f32 %v1942_v40, %v1905_v32 }
 0x1e4   : > { %3649 = shalt.err (!%p3646_p8)
}
 0x1e5   : > { %s3650_s28 = scalar_lea.hbm %s4804_s15, 16  ;;  %s3654_s29 = scalar_lea.hbm %s4908_s3, 32 }
 0x1e6   : > { %p3651_p9 = scmp.ne.s32.totalorder %s4804_s15, %s3650_s28  ;;  %p3655_p0 = scmp.lt.u32.totalorder %s4804_s15, %s4908_s3 }
 0x1e7   : > { %p3656_p3 = scmp.lt.u32.totalorder %s3654_s29, %s3650_s28  ;;  %p3658_p4 = scmp.lt.u32.totalorder %s3650_s28, %s4804_s15 }
 0x1e8   : > { %p3652_p10 = pnand %p3651_p9, %p3923_p12 }
 0x1e9   : > { %p3657_p1 = por %p3656_p3, %p3655_p0 }
 0x1ea   : > { %p3653_p11 = pneg %p3652_p10 }
 0x1eb   : > { %p3659_p2 = por %p3658_p4, %p3657_p1 }
 0x1ed   : > { %p3660_p5 = pnand %p3659_p2, %p3653_p11 }
 0x1ef   : > { %3663 = shalt.err (!%p3660_p5)
}
 0x1f0   : > { %3501 = dma.vmem_to_hbm [thread:$0]  (%p3923_p12), %s4806_s23, 16, %s4804_s15, %s1951_s5   ;;  %1944 = vst [vmem:[%s3956_s24] sm:$0x1] %v1943_v35 }
 0x1f1   : > { %s3664_s11 = scalar_lea.vmem %s4814_s6, 16  ;;  %s3793_s12 = smov [#allocation6]  }
 0x1f2   : > { %p3665_p6 = scmp.ne.s32.totalorder %s4814_s6, %s3664_s11  ;;  %s3668_s9 = sshll.u32 %s3793_s12, 4  ;;  %s3669_s9 = int_to_ptr.vmem [resolvable:$false] %s3668_s9 }
 0x1f3   : > { %s3670_s7 = scalar_lea.vmem %s3669_s9, 32  ;;  %p3671_p10 = scmp.lt.s32.totalorder %s4814_s6, %s3669_s9 }
 0x1f4   : > { %p3666_p8 = pnand %p3665_p6, %p3923_p12  ;;  %p3672_p11 = scmp.lt.s32.totalorder %s3670_s7, %s3664_s11 }
 0x1f6   : > { %p3667_p9 = pneg %p3666_p8  ;;  %p3673_p0 = por %p3672_p11, %p3671_p10 }
 0x1f8   : > { %p3674_p3 = pnand %p3673_p0, %p3667_p9 }
 0x1fa   : > { %3677 = shalt.err (!%p3674_p3)
}
 0x1fb   : > { %s3678_s24 = scalar_lea.hbm %s4812_s8, 16  ;;  %s3682_s28 = scalar_lea.hbm %s4909_s4, 32 }
 0x1fc   : > { %p3679_p1 = scmp.ne.s32.totalorder %s4812_s8, %s3678_s24  ;;  %p3683_p5 = scmp.lt.u32.totalorder %s4812_s8, %s4909_s4 }
 0x1fd   : > { %p3684_p6 = scmp.lt.u32.totalorder %s3682_s28, %s3678_s24  ;;  %p3686_p9 = scmp.lt.u32.totalorder %s3678_s24, %s4812_s8 }
 0x1fe   : > { %p3680_p4 = pnand %p3679_p1, %p3923_p12 }
 0x1ff   : > { %p3685_p8 = por %p3684_p6, %p3683_p5 }
 0x200   : > { %p3681_p2 = pneg %p3680_p4 }
 0x201   : > { %p3687_p10 = por %p3686_p9, %p3685_p8 }
 0x203   : > { %p3688_p11 = pnand %p3687_p10, %p3681_p2 }
 0x205   : > { %3691 = shalt.err (!%p3688_p11)
}
 0x206   : > { %3502 = dma.vmem_to_hbm [thread:$0]  (%p3923_p12), %s4814_s6, 16, %s4812_s8, %s1951_s5  }
 0x207 PF: > { %p3516_p0 = scmp.ge.s32.totalorder %s3786_s25, 2  ;;  %s2011_s29 = sand.u32 1, %s3758_s18  }
 0x208   : > { %s2012_s22 = scalar_lea.sflag [#allocation3], %s2011_s29 }
 0x209   : > { %p3507_p3 = pnand %p3516_p0, %p3911_p7 }
 0x20b   : > { %3737 = dma.done.wait (!%p3507_p3), %s2012_s22, 2048  }
 0x20c   : > { %3739 = vsyncadd (!%p3507_p3), %s2012_s22, 4294965248  ;;  %s4932_s21 = sadd.s32 4294967294, %s3786_s25   ;;  %p3510_p1 = pnand %p3516_p0, %p3935_p13 }
 0x20d   : > { %s2020_s13 = sand.u32 1, %s4932_s21  }
 0x20e   : > { %s2021_s30 = scalar_lea.sflag [#allocation5], %s2020_s13 }
 0x20f   : > { %3741 = dma.done.wait (!%p3510_p1), %s2021_s30, 32  }
 0x210   : > { %3743 = vsyncadd (!%p3510_p1), %s2021_s30, 4294967264  ;;  %s21_s25 = sadd.s32 1, %s3786_s25   ;;  %s4933_s10 = sld [smem:[#allocation13_spill]] }
 0x211   : > { %p18_p12 = scmp.ge.s32.totalorder %s21_s25, 6   ;;  %s4934_s21 = sld [smem:[#allocation9_spill]] }
 0x212   : > { %s4935_s22 = sld [smem:[#allocation10_spill]]  ;;  %s4936_s23 = sld [smem:[#allocation11_spill]] }
 0x213   : > { %s4937_s24 = sld [smem:[#allocation12_spill]]  ;;  %s4938_s15 = smov %s3750_s16 }
 0x214   : > { %s4939_s16 = smov %s3754_s17  ;;  %s4940_s17 = smov %s3928_s14 }
 0x215   : > { %s4941_s18 = smov %s3762_s19  ;;  %s4942_s19 = smov %s3766_s20 }
 0x216   : > { %s4943_s20 = smov %s4933_s10  ;;  %20 = sbr.rel (!%p18_p12) target bundleno = 11 (0xb), region = 108 }
 0x21d   :  { %2033 = vsyncpa [#allocation3], 1 }
 0x21e   :  { %2035 = vsyncpa [#allocation3 + $0x1], 1 }
 0x21f   :  { %2036 = vsyncpa [#allocation5], 1 }
 0x220   :  { %2038 = vsyncpa [#allocation5 + $0x1], 1 }

</bundles_post_ra>
